<compile_context>
chip_gen: v7x
topology: tpu7x:2x2x1
jax: 0.10.0
libtpu: 0.0.40
codegen_flags: <defaults>
</compile_context>

<pallas_src>
import jax
import jax.numpy as jnp
from jax.experimental import pallas as pl
from jax.experimental.pallas import tpu as pltpu


# --------------------------------------------------------------------------
# Kernel: one grid step == one chunk of cT timesteps (both directions)
# --------------------------------------------------------------------------
def bilstm_kernel(emb_f_ref,      # (B, cT, E)  embeddings, forward chunk
                  emb_b_ref,      # (B, cT, E)  embeddings, mirrored backward chunk
                  wih_f_ref,      # (E, 4H)
                  wih_b_ref,      # (E, 4H)
                  b_f_ref,        # (1, 4H)     b_ih + b_hh, forward
                  b_b_ref,        # (1, 4H)     b_ih + b_hh, backward
                  whh_ref,        # (2H, 8H)    blockdiag(Whh_f, Whh_b)
                  fcw_ref,        # (2H, Cp)    fc weight (lane-padded)
                  fcb_ref,        # (1, Cp)
                  out_ref,        # (B, Cp)     logits (written on last chunk)
                  h_ref,          # scratch (B, 2H)  [h_fwd | h_bwd]
                  cf_ref,         # scratch (B, H)   c_fwd
                  cb_ref):        # scratch (B, H)   c_bwd
    chunk = pl.program_id(0)
    n_chunks = pl.num_programs(0)

    B, cT, E = emb_f_ref.shape
    H = cf_ref.shape[1]
    G = 4 * H

    @pl.when(chunk == 0)
    def _init():
        h_ref[...] = jnp.zeros_like(h_ref)
        cf_ref[...] = jnp.zeros_like(cf_ref)
        cb_ref[...] = jnp.zeros_like(cb_ref)

    # ---- hoisted per-chunk input projections (biases folded in).
    # (B, cT, E) -> (B*cT, E) keeps the lane dim intact and is a pure sublane
    # re-index when cT % 8 == 0 (the wrapper guarantees cT % 8 == 0 or cT == T).
    emb_f = emb_f_ref[...].reshape(B * cT, E)
    emb_b = emb_b_ref[...].reshape(B * cT, E)
    proj_f = (jnp.dot(emb_f, wih_f_ref[...], preferred_element_type=jnp.float32)
              + b_f_ref[...]).reshape(B, cT, G)
    proj_b = (jnp.dot(emb_b, wih_b_ref[...], preferred_element_type=jnp.float32)
              + b_b_ref[...]).reshape(B, cT, G)

    whh = whh_ref[...]            # (2H, 8H), block-diagonal

    h_cat = h_ref[...]            # (B, 2H)
    c_f = cf_ref[...]             # (B, H)
    c_b = cb_ref[...]             # (B, H)

    def half_cell(g, c):
        i = jax.nn.sigmoid(g[:, 0 * H:1 * H])
        f = jax.nn.sigmoid(g[:, 1 * H:2 * H])
        gg = jnp.tanh(g[:, 2 * H:3 * H])
        o = jax.nn.sigmoid(g[:, 3 * H:4 * H])
        c_new = f * c + i * gg
        return o * jnp.tanh(c_new), c_new

    # Small static unroll over the chunk (cT steps); the grid axis bounds the
    # live range of proj_f/proj_b across chunks.
    for t in range(cT):
        # Single fused matmul for both directions: K = 2H, N = 8H.
        gates = jnp.dot(h_cat, whh, preferred_element_type=jnp.float32)  # (B, 8H)
        g_f = gates[:, :G] + proj_f[:, t, :]
        g_b = gates[:, G:] + proj_b[:, cT - 1 - t, :]   # backward dir, reversed time
        h_f, c_f = half_cell(g_f, c_f)
        h_b, c_b = half_cell(g_b, c_b)
        h_cat = jnp.concatenate([h_f, h_b], axis=1)

    h_ref[...] = h_cat
    cf_ref[...] = c_f
    cb_ref[...] = c_b

    @pl.when(chunk == n_chunks - 1)
    def _final():
        out_ref[...] = (jnp.dot(h_cat, fcw_ref[...],
                                preferred_element_type=jnp.float32)
                        + fcb_ref[...])


# --------------------------------------------------------------------------
# Wrapper
# --------------------------------------------------------------------------
def _round_up(x, m):
    return ((x + m - 1) // m) * m


def _pick_time_chunk(T, B, E, H, requested=None):
    """Largest multiple-of-8 divisor of T whose streamed chunk stays small
    relative to the smallest per-generation VMEM (v7x: 64 MiB physical)."""
    if requested is not None:
        assert T % requested == 0, "time_chunk must divide T"
        return requested
    if T % 8 != 0:
        return T                      # fallback: single full-sequence chunk
    budget = 8 * 1024 * 1024          # streamed bytes per chunk (dbl-buffered)
    per_step = 4 * B * (2 * 2 * E + 2 * 4 * H)
    best = 8
    for cand in range(8, T + 1, 8):
        if T % cand == 0 and cand * per_step <= budget:
            best = cand
    return best


def sentiment_bilstm_forward(x, params, *, time_chunk=None):
    """x: (B, T) int32 token ids.  Returns logits (B, C) float32."""
    emb_table = params["embedding"]            # (V, E)
    B, T = x.shape
    E = emb_table.shape[1]
    H = params["whh_f"].shape[0]
    C = params["fc_w"].shape[1]
    Cp = _round_up(C, 128)                     # lane-dense output store

    # Embedding gather stays in XLA; the result is fed in its natural (B, T, E)
    # layout (no transpose/pad copy in HBM).
    # TODO(synk): move the gather in-kernel via scalar-prefetched ids + DMA.
    embedded = jnp.take(emb_table, x, axis=0).astype(jnp.float32)   # (B, T, E)

    cT = _pick_time_chunk(T, B, E, H, time_chunk)
    n_chunks = T // cT
    assert n_chunks * cT == T

    wih_f = params["wih_f"]                    # (E, 4H)
    wih_b = params["wih_b"]                    # (E, 4H)
    b_f = params["b_f"]                        # (1, 4H)
    b_b = params["b_b"]                        # (1, 4H)

    # Block-diagonal recurrent weight so both directions share one MXU matmul.
    whh_bd = jnp.zeros((2 * H, 8 * H), jnp.float32)
    whh_bd = whh_bd.at[:H, :4 * H].set(params["whh_f"])
    whh_bd = whh_bd.at[H:, 4 * H:].set(params["whh_b"])

    fcw_p = jnp.zeros((2 * H, Cp), jnp.float32).at[:, :C].set(params["fc_w"])
    fcb_p = jnp.zeros((1, Cp), jnp.float32).at[:, :C].set(params["fc_b"])

    # ---- specs
    emb_f_spec = pl.BlockSpec((B, cT, E), lambda c: (0, c, 0))
    emb_b_spec = pl.BlockSpec((B, cT, E), lambda c: (0, n_chunks - 1 - c, 0))

    def resident(arr):
        nd = arr.ndim
        return pl.BlockSpec(arr.shape, lambda c, _nd=nd: (0,) * _nd)

    out_spec = pl.BlockSpec((B, Cp), lambda c: (0, 0))

    scratch_shapes = [pltpu.VMEM((B, 2 * H), jnp.float32),
                      pltpu.VMEM((B, H), jnp.float32),
                      pltpu.VMEM((B, H), jnp.float32)]

    # ---- VMEM budget (48 MiB is safe on every generation: v7x has 64 MiB
    # physical; v5e/v6e could go higher for larger chunks).
    chunk_bytes = 4 * (2 * 2 * B * cT * E        # emb fwd+bwd, double-buffered
                       + 2 * B * cT * 4 * H)     # proj_f + proj_b
    weight_bytes = 4 * (wih_f.size + wih_b.size + b_f.size + b_b.size
                        + whh_bd.size + fcw_p.size + fcb_p.size)
    state_bytes = 4 * (B * 2 * H + 2 * B * H + B * Cp)
    est = chunk_bytes + weight_bytes + state_bytes
    vmem_limit = int(min(max(4 * est, 16 * 1024 * 1024), 48 * 1024 * 1024))

    flops = (2 * 2 * T * B * E * 4 * H           # chunked input projections
             + 2 * T * B * (2 * H) * (8 * H)     # fused recurrence matmuls
             + 2 * B * 2 * H * Cp)               # final fc
    transcendentals = 2 * T * B * 5 * H
    bytes_accessed = 4 * (2 * embedded.size + wih_f.size + wih_b.size
                          + b_f.size + b_b.size + whh_bd.size
                          + fcw_p.size + fcb_p.size + B * Cp)

    out = pl.pallas_call(
        bilstm_kernel,
        out_shape=jax.ShapeDtypeStruct((B, Cp), jnp.float32),
        grid_spec=pltpu.PrefetchScalarGridSpec(
            num_scalar_prefetch=0,
            grid=(n_chunks,),
            in_specs=[emb_f_spec, emb_b_spec,
                      resident(wih_f), resident(wih_b),
                      resident(b_f), resident(b_b),
                      resident(whh_bd), resident(fcw_p), resident(fcb_p)],
            out_specs=out_spec,
            scratch_shapes=scratch_shapes),
        compiler_params=pltpu.CompilerParams(
            dimension_semantics=("arbitrary",),   # sequential recurrence
            vmem_limit_bytes=vmem_limit),
        cost_estimate=pl.CostEstimate(flops=int(flops),
                                      transcendentals=int(transcendentals),
                                      bytes_accessed=int(bytes_accessed)),
    )(embedded, embedded, wih_f, wih_b, b_f, b_b, whh_bd, fcw_p, fcb_p)

    return out[:, :C]


# --------------------------------------------------------------------------
# Params / reference
# --------------------------------------------------------------------------
def init_params(key, vocab_size, embedding_dim, hidden_dim, num_classes):
    V, E, H, C = vocab_size, embedding_dim, hidden_dim, num_classes
    ks = jax.random.split(key, 12)
    s = 0.1

    emb = jax.random.normal(ks[0], (V, E), jnp.float32) * s
    emb = emb.at[0].set(0.0)                         # padding_idx=0 row is zero

    def w(k, shape):
        return jax.random.normal(k, shape, jnp.float32) * s

    # PyTorch stores (4H, E)/(4H, H); pre-transpose to (E, 4H)/(H, 4H).
    wih_f = w(ks[1], (4 * H, E)).T
    whh_f = w(ks[2], (4 * H, H)).T
    b_f = (w(ks[3], (4 * H,)) + w(ks[4], (4 * H,))).reshape(1, 4 * H)  # b_ih + b_hh
    wih_b = w(ks[5], (4 * H, E)).T
    whh_b = w(ks[6], (4 * H, H)).T
    b_b = (w(ks[7], (4 * H,)) + w(ks[8], (4 * H,))).reshape(1, 4 * H)
    fc_w = w(ks[9], (C, 2 * H)).T                    # (2H, C)
    fc_b = w(ks[10], (C,)).reshape(1, C)

    return dict(embedding=emb, wih_f=wih_f, whh_f=whh_f, b_f=b_f,
                wih_b=wih_b, whh_b=whh_b, b_b=b_b, fc_w=fc_w, fc_b=fc_b)


def reference_forward(x, params):
    """Pure-JAX reference replicating torch semantics (eval mode)."""
    emb = jnp.take(params["embedding"], x, axis=0)   # (B, T, E)
    B, T, E = emb.shape
    H = params["whh_f"].shape[0]
    hp = jax.lax.Precision.HIGHEST

    def run(wih, whh, b, reverse):
        h = jnp.zeros((B, H), jnp.float32)
        c = jnp.zeros((B, H), jnp.float32)
        ts = range(T - 1, -1, -1) if reverse else range(T)
        for t in ts:
            gates = (jnp.dot(emb[:, t, :], wih, precision=hp)
                     + jnp.dot(h, whh, precision=hp) + b)
            i = jax.nn.sigmoid(gates[:, 0 * H:1 * H])
            f = jax.nn.sigmoid(gates[:, 1 * H:2 * H])
            g = jnp.tanh(gates[:, 2 * H:3 * H])
            o = jax.nn.sigmoid(gates[:, 3 * H:4 * H])
            c = f * c + i * g
            h = o * jnp.tanh(c)
        return h

    h_fw = run(params["wih_f"], params["whh_f"], params["b_f"], reverse=False)
    h_bw = run(params["wih_b"], params["whh_b"], params["b_b"], reverse=True)
    hc = jnp.concatenate([h_fw, h_bw], axis=1)
    return jnp.dot(hc, params["fc_w"], precision=hp) + params["fc_b"]


# --------------------------------------------------------------------------
if __name__ == "__main__":
    VOCAB, E, H, C = 50, 32, 32, 3
    B, T = 2, 16

    key = jax.random.PRNGKey(0)
    pkey, xkey = jax.random.split(key)
    params = init_params(pkey, VOCAB, E, H, C)
    x = jax.random.randint(xkey, (B, T), 0, VOCAB, dtype=jnp.int32)

    # time_chunk=8 -> 2 grid steps, exercising the chunked/streamed path.
    out = sentiment_bilstm_forward(x, params, time_chunk=8)
    out = jax.block_until_ready(out)

    ref = jax.block_until_ready(reference_forward(x, params))
    assert out.shape == (B, C)
    err = float(jnp.max(jnp.abs(out - ref)))
    assert jnp.allclose(out, ref, atol=2e-3, rtol=2e-3), f"mismatch vs reference (max abs err {err})"

    print("KERNEL_OK")
</pallas_src>

<mosaic_0001>
module attributes {stable_mosaic.version = 11 : i64} {
  func.func @bilstm_kernel(%arg0: i32, %arg1: memref<2x8x32xf32, #tpu.memory_space<vmem>>, %arg2: memref<2x8x32xf32, #tpu.memory_space<vmem>>, %arg3: memref<32x128xf32, #tpu.memory_space<vmem>>, %arg4: memref<32x128xf32, #tpu.memory_space<vmem>>, %arg5: memref<1x128xf32, #tpu.memory_space<vmem>>, %arg6: memref<1x128xf32, #tpu.memory_space<vmem>>, %arg7: memref<64x256xf32, #tpu.memory_space<vmem>>, %arg8: memref<64x128xf32, #tpu.memory_space<vmem>>, %arg9: memref<1x128xf32, #tpu.memory_space<vmem>>, %arg10: memref<2x128xf32, #tpu.memory_space<vmem>>, %arg11: memref<2x64xf32, #tpu.memory_space<vmem>>, %arg12: memref<2x32xf32, #tpu.memory_space<vmem>>, %arg13: memref<2x32xf32, #tpu.memory_space<vmem>>) attributes {dimension_semantics = [#tpu.dimension_semantics<arbitrary>], iteration_bounds = array<i64: 2>, scalar_prefetch = 0 : i64, scratch_operands = 3 : i64, tpu.core_type = #tpu.core_type<tc>, window_params = [{transform_indices = @transform_0, window_bounds = array<i64: 2, 8, 32>}, {transform_indices = @transform_1, window_bounds = array<i64: 2, 8, 32>}, {pipeline_mode = #tpu.pipeline_mode<synchronous>, transform_indices = @transform_2, window_bounds = array<i64: 32, 128>}, {pipeline_mode = #tpu.pipeline_mode<synchronous>, transform_indices = @transform_3, window_bounds = array<i64: 32, 128>}, {pipeline_mode = #tpu.pipeline_mode<synchronous>, transform_indices = @transform_4, window_bounds = array<i64: 1, 128>}, {pipeline_mode = #tpu.pipeline_mode<synchronous>, transform_indices = @transform_5, window_bounds = array<i64: 1, 128>}, {pipeline_mode = #tpu.pipeline_mode<synchronous>, transform_indices = @transform_6, window_bounds = array<i64: 64, 256>}, {pipeline_mode = #tpu.pipeline_mode<synchronous>, transform_indices = @transform_7, window_bounds = array<i64: 64, 128>}, {pipeline_mode = #tpu.pipeline_mode<synchronous>, transform_indices = @transform_8, window_bounds = array<i64: 1, 128>}, {pipeline_mode = #tpu.pipeline_mode<synchronous>, transform_indices = @transform_9, window_bounds = array<i64: 2, 128>}]} {
    %c0_i32 = arith.constant 0 : i32
    %0 = arith.cmpi eq, %arg0, %c0_i32 : i32
    %1 = arith.extui %0 : i1 to i32
    %c0_i32_0 = arith.constant 0 : i32
    %2 = arith.cmpi ne, %1, %c0_i32_0 : i32
    scf.if %2 {
      %cst_86 = arith.constant 0.000000e+00 : f32
      %509 = vector.broadcast %cst_86 : f32 to vector<2x64xf32>
      %c0_87 = arith.constant 0 : index
      %c0_88 = arith.constant 0 : index
      %510 = vector.load %arg11[%c0_87, %c0_88] : memref<2x64xf32, #tpu.memory_space<vmem>>, vector<2x64xf32>
      tpu.vector_store %arg11[%c0_87, %c0_88], %509 {strides = array<i32>} : memref<2x64xf32, #tpu.memory_space<vmem>>, vector<2x64xf32>,
      %cst_89 = arith.constant 0.000000e+00 : f32
      %511 = vector.broadcast %cst_89 : f32 to vector<2x32xf32>
      %c0_90 = arith.constant 0 : index
      %c0_91 = arith.constant 0 : index
      %512 = vector.load %arg12[%c0_90, %c0_91] : memref<2x32xf32, #tpu.memory_space<vmem>>, vector<2x32xf32>
      tpu.vector_store %arg12[%c0_90, %c0_91], %511 {strides = array<i32>} : memref<2x32xf32, #tpu.memory_space<vmem>>, vector<2x32xf32>,
      %cst_92 = arith.constant 0.000000e+00 : f32
      %513 = vector.broadcast %cst_92 : f32 to vector<2x32xf32>
      %c0_93 = arith.constant 0 : index
      %c0_94 = arith.constant 0 : index
      %514 = vector.load %arg13[%c0_93, %c0_94] : memref<2x32xf32, #tpu.memory_space<vmem>>, vector<2x32xf32>
      tpu.vector_store %arg13[%c0_93, %c0_94], %513 {strides = array<i32>} : memref<2x32xf32, #tpu.memory_space<vmem>>, vector<2x32xf32>,
    } else {
    }
    %c0 = arith.constant 0 : index
    %c0_1 = arith.constant 0 : index
    %c0_2 = arith.constant 0 : index
    %3 = vector.load %arg1[%c0, %c0_1, %c0_2] : memref<2x8x32xf32, #tpu.memory_space<vmem>>, vector<2x8x32xf32>
    %4 = vector.shape_cast %3 : vector<2x8x32xf32> to vector<16x32xf32>
    %c0_3 = arith.constant 0 : index
    %c0_4 = arith.constant 0 : index
    %c0_5 = arith.constant 0 : index
    %5 = vector.load %arg2[%c0_3, %c0_4, %c0_5] : memref<2x8x32xf32, #tpu.memory_space<vmem>>, vector<2x8x32xf32>
    %6 = vector.shape_cast %5 : vector<2x8x32xf32> to vector<16x32xf32>
    %c0_6 = arith.constant 0 : index
    %c0_7 = arith.constant 0 : index
    %7 = vector.load %arg3[%c0_6, %c0_7] : memref<32x128xf32, #tpu.memory_space<vmem>>, vector<32x128xf32>
    %cst = arith.constant dense<0.000000e+00> : vector<16x128xf32>
    %8 = tpu.matmul %4, %7, %cst {dimension_numbers = #tpu.dot_dimension_numbers<[1], [0], [0], [1], [0, 0, 1, 1], [], []>} : vector<16x32xf32>, vector<32x128xf32>, vector<16x128xf32> -> vector<16x128xf32>
    %c0_8 = arith.constant 0 : index
    %c0_9 = arith.constant 0 : index
    %9 = vector.load %arg5[%c0_8, %c0_9] : memref<1x128xf32, #tpu.memory_space<vmem>>, vector<1x128xf32>
    %10 = vector.broadcast %9 : vector<1x128xf32> to vector<16x128xf32>
    %11 = arith.addf %8, %10 : vector<16x128xf32>
    %12 = vector.shape_cast %11 : vector<16x128xf32> to vector<2x8x128xf32>
    %c0_10 = arith.constant 0 : index
    %c0_11 = arith.constant 0 : index
    %13 = vector.load %arg4[%c0_10, %c0_11] : memref<32x128xf32, #tpu.memory_space<vmem>>, vector<32x128xf32>
    %cst_12 = arith.constant dense<0.000000e+00> : vector<16x128xf32>
    %14 = tpu.matmul %6, %13, %cst_12 {dimension_numbers = #tpu.dot_dimension_numbers<[1], [0], [0], [1], [0, 0, 1, 1], [], []>} : vector<16x32xf32>, vector<32x128xf32>, vector<16x128xf32> -> vector<16x128xf32>
    %c0_13 = arith.constant 0 : index
    %c0_14 = arith.constant 0 : index
    %15 = vector.load %arg6[%c0_13, %c0_14] : memref<1x128xf32, #tpu.memory_space<vmem>>, vector<1x128xf32>
    %16 = vector.broadcast %15 : vector<1x128xf32> to vector<16x128xf32>
    %17 = arith.addf %14, %16 : vector<16x128xf32>
    %18 = vector.shape_cast %17 : vector<16x128xf32> to vector<2x8x128xf32>
    %c0_15 = arith.constant 0 : index
    %c0_16 = arith.constant 0 : index
    %19 = vector.load %arg7[%c0_15, %c0_16] : memref<64x256xf32, #tpu.memory_space<vmem>>, vector<64x256xf32>
    %c0_17 = arith.constant 0 : index
    %c0_18 = arith.constant 0 : index
    %20 = vector.load %arg11[%c0_17, %c0_18] : memref<2x64xf32, #tpu.memory_space<vmem>>, vector<2x64xf32>
    %c0_19 = arith.constant 0 : index
    %c0_20 = arith.constant 0 : index
    %21 = vector.load %arg12[%c0_19, %c0_20] : memref<2x32xf32, #tpu.memory_space<vmem>>, vector<2x32xf32>
    %c0_21 = arith.constant 0 : index
    %c0_22 = arith.constant 0 : index
    %22 = vector.load %arg13[%c0_21, %c0_22] : memref<2x32xf32, #tpu.memory_space<vmem>>, vector<2x32xf32>
    %cst_23 = arith.constant dense<0.000000e+00> : vector<2x256xf32>
    %23 = tpu.matmul %20, %19, %cst_23 {dimension_numbers = #tpu.dot_dimension_numbers<[1], [0], [0], [1], [0, 0, 1, 1], [], []>} : vector<2x64xf32>, vector<64x256xf32>, vector<2x256xf32> -> vector<2x256xf32>
    %24 = vector.extract_strided_slice %23 {offsets = [0, 0], sizes = [2, 128], strides = [1, 1]} : vector<2x256xf32> to vector<2x128xf32>
    %25 = vector.extract_strided_slice %12 {offsets = [0, 0, 0], sizes = [2, 1, 128], strides = [1, 1, 1]} : vector<2x8x128xf32> to vector<2x1x128xf32>
    %26 = vector.shape_cast %25 : vector<2x1x128xf32> to vector<2x128xf32>
    %27 = arith.addf %24, %26 : vector<2x128xf32>
    %28 = vector.extract_strided_slice %23 {offsets = [0, 128], sizes = [2, 128], strides = [1, 1]} : vector<2x256xf32> to vector<2x128xf32>
    %29 = vector.extract_strided_slice %18 {offsets = [0, 7, 0], sizes = [2, 1, 128], strides = [1, 1, 1]} : vector<2x8x128xf32> to vector<2x1x128xf32>
    %30 = vector.shape_cast %29 : vector<2x1x128xf32> to vector<2x128xf32>
    %31 = arith.addf %28, %30 : vector<2x128xf32>
    %32 = vector.extract_strided_slice %27 {offsets = [0, 0], sizes = [2, 32], strides = [1, 1]} : vector<2x128xf32> to vector<2x32xf32>
    %33 = arith.negf %32 : vector<2x32xf32>
    %34 = math.exp %33 : vector<2x32xf32>
    %cst_24 = arith.constant 1.000000e+00 : f32
    %35 = vector.broadcast %cst_24 : f32 to vector<2x32xf32>
    %36 = arith.addf %35, %34 : vector<2x32xf32>
    %37 = arith.divf %35, %36 : vector<2x32xf32>
    %38 = vector.extract_strided_slice %27 {offsets = [0, 32], sizes = [2, 32], strides = [1, 1]} : vector<2x128xf32> to vector<2x32xf32>
    %39 = arith.negf %38 : vector<2x32xf32>
    %40 = math.exp %39 : vector<2x32xf32>
    %cst_25 = arith.constant 1.000000e+00 : f32
    %41 = vector.broadcast %cst_25 : f32 to vector<2x32xf32>
    %42 = arith.addf %41, %40 : vector<2x32xf32>
    %43 = arith.divf %41, %42 : vector<2x32xf32>
    %44 = vector.extract_strided_slice %27 {offsets = [0, 64], sizes = [2, 32], strides = [1, 1]} : vector<2x128xf32> to vector<2x32xf32>
    %45 = math.tanh %44 : vector<2x32xf32>
    %46 = vector.extract_strided_slice %27 {offsets = [0, 96], sizes = [2, 32], strides = [1, 1]} : vector<2x128xf32> to vector<2x32xf32>
    %47 = arith.negf %46 : vector<2x32xf32>
    %48 = math.exp %47 : vector<2x32xf32>
    %cst_26 = arith.constant 1.000000e+00 : f32
    %49 = vector.broadcast %cst_26 : f32 to vector<2x32xf32>
    %50 = arith.addf %49, %48 : vector<2x32xf32>
    %51 = arith.divf %49, %50 : vector<2x32xf32>
    %52 = arith.mulf %43, %21 : vector<2x32xf32>
    %53 = arith.mulf %37, %45 : vector<2x32xf32>
    %54 = arith.addf %52, %53 : vector<2x32xf32>
    %55 = math.tanh %54 : vector<2x32xf32>
    %56 = arith.mulf %51, %55 : vector<2x32xf32>
    %57 = vector.extract_strided_slice %31 {offsets = [0, 0], sizes = [2, 32], strides = [1, 1]} : vector<2x128xf32> to vector<2x32xf32>
    %58 = arith.negf %57 : vector<2x32xf32>
    %59 = math.exp %58 : vector<2x32xf32>
    %cst_27 = arith.constant 1.000000e+00 : f32
    %60 = vector.broadcast %cst_27 : f32 to vector<2x32xf32>
    %61 = arith.addf %60, %59 : vector<2x32xf32>
    %62 = arith.divf %60, %61 : vector<2x32xf32>
    %63 = vector.extract_strided_slice %31 {offsets = [0, 32], sizes = [2, 32], strides = [1, 1]} : vector<2x128xf32> to vector<2x32xf32>
    %64 = arith.negf %63 : vector<2x32xf32>
    %65 = math.exp %64 : vector<2x32xf32>
    %cst_28 = arith.constant 1.000000e+00 : f32
    %66 = vector.broadcast %cst_28 : f32 to vector<2x32xf32>
    %67 = arith.addf %66, %65 : vector<2x32xf32>
    %68 = arith.divf %66, %67 : vector<2x32xf32>
    %69 = vector.extract_strided_slice %31 {offsets = [0, 64], sizes = [2, 32], strides = [1, 1]} : vector<2x128xf32> to vector<2x32xf32>
    %70 = math.tanh %69 : vector<2x32xf32>
    %71 = vector.extract_strided_slice %31 {offsets = [0, 96], sizes = [2, 32], strides = [1, 1]} : vector<2x128xf32> to vector<2x32xf32>
    %72 = arith.negf %71 : vector<2x32xf32>
    %73 = math.exp %72 : vector<2x32xf32>
    %cst_29 = arith.constant 1.000000e+00 : f32
    %74 = vector.broadcast %cst_29 : f32 to vector<2x32xf32>
    %75 = arith.addf %74, %73 : vector<2x32xf32>
    %76 = arith.divf %74, %75 : vector<2x32xf32>
    %77 = arith.mulf %68, %22 : vector<2x32xf32>
    %78 = arith.mulf %62, %70 : vector<2x32xf32>
    %79 = arith.addf %77, %78 : vector<2x32xf32>
    %80 = math.tanh %79 : vector<2x32xf32>
    %81 = arith.mulf %76, %80 : vector<2x32xf32>
    %82 = tpu.concatenate %56, %81 in 1 : vector<2x32xf32>, vector<2x32xf32> -> vector<2x64xf32>
    %cst_30 = arith.constant dense<0.000000e+00> : vector<2x256xf32>
    %83 = tpu.matmul %82, %19, %cst_30 {dimension_numbers = #tpu.dot_dimension_numbers<[1], [0], [0], [1], [0, 0, 1, 1], [], []>} : vector<2x64xf32>, vector<64x256xf32>, vector<2x256xf32> -> vector<2x256xf32>
    %84 = vector.extract_strided_slice %83 {offsets = [0, 0], sizes = [2, 128], strides = [1, 1]} : vector<2x256xf32> to vector<2x128xf32>
    %85 = vector.extract_strided_slice %12 {offsets = [0, 1, 0], sizes = [2, 1, 128], strides = [1, 1, 1]} : vector<2x8x128xf32> to vector<2x1x128xf32>
    %86 = vector.shape_cast %85 : vector<2x1x128xf32> to vector<2x128xf32>
    %87 = arith.addf %84, %86 : vector<2x128xf32>
    %88 = vector.extract_strided_slice %83 {offsets = [0, 128], sizes = [2, 128], strides = [1, 1]} : vector<2x256xf32> to vector<2x128xf32>
    %89 = vector.extract_strided_slice %18 {offsets = [0, 6, 0], sizes = [2, 1, 128], strides = [1, 1, 1]} : vector<2x8x128xf32> to vector<2x1x128xf32>
    %90 = vector.shape_cast %89 : vector<2x1x128xf32> to vector<2x128xf32>
    %91 = arith.addf %88, %90 : vector<2x128xf32>
    %92 = vector.extract_strided_slice %87 {offsets = [0, 0], sizes = [2, 32], strides = [1, 1]} : vector<2x128xf32> to vector<2x32xf32>
    %93 = arith.negf %92 : vector<2x32xf32>
    %94 = math.exp %93 : vector<2x32xf32>
    %cst_31 = arith.constant 1.000000e+00 : f32
    %95 = vector.broadcast %cst_31 : f32 to vector<2x32xf32>
    %96 = arith.addf %95, %94 : vector<2x32xf32>
    %97 = arith.divf %95, %96 : vector<2x32xf32>
    %98 = vector.extract_strided_slice %87 {offsets = [0, 32], sizes = [2, 32], strides = [1, 1]} : vector<2x128xf32> to vector<2x32xf32>
    %99 = arith.negf %98 : vector<2x32xf32>
    %100 = math.exp %99 : vector<2x32xf32>
    %cst_32 = arith.constant 1.000000e+00 : f32
    %101 = vector.broadcast %cst_32 : f32 to vector<2x32xf32>
    %102 = arith.addf %101, %100 : vector<2x32xf32>
    %103 = arith.divf %101, %102 : vector<2x32xf32>
    %104 = vector.extract_strided_slice %87 {offsets = [0, 64], sizes = [2, 32], strides = [1, 1]} : vector<2x128xf32> to vector<2x32xf32>
    %105 = math.tanh %104 : vector<2x32xf32>
    %106 = vector.extract_strided_slice %87 {offsets = [0, 96], sizes = [2, 32], strides = [1, 1]} : vector<2x128xf32> to vector<2x32xf32>
    %107 = arith.negf %106 : vector<2x32xf32>
    %108 = math.exp %107 : vector<2x32xf32>
    %cst_33 = arith.constant 1.000000e+00 : f32
    %109 = vector.broadcast %cst_33 : f32 to vector<2x32xf32>
    %110 = arith.addf %109, %108 : vector<2x32xf32>
    %111 = arith.divf %109, %110 : vector<2x32xf32>
    %112 = arith.mulf %103, %54 : vector<2x32xf32>
    %113 = arith.mulf %97, %105 : vector<2x32xf32>
    %114 = arith.addf %112, %113 : vector<2x32xf32>
    %115 = math.tanh %114 : vector<2x32xf32>
    %116 = arith.mulf %111, %115 : vector<2x32xf32>
    %117 = vector.extract_strided_slice %91 {offsets = [0, 0], sizes = [2, 32], strides = [1, 1]} : vector<2x128xf32> to vector<2x32xf32>
    %118 = arith.negf %117 : vector<2x32xf32>
    %119 = math.exp %118 : vector<2x32xf32>
    %cst_34 = arith.constant 1.000000e+00 : f32
    %120 = vector.broadcast %cst_34 : f32 to vector<2x32xf32>
    %121 = arith.addf %120, %119 : vector<2x32xf32>
    %122 = arith.divf %120, %121 : vector<2x32xf32>
    %123 = vector.extract_strided_slice %91 {offsets = [0, 32], sizes = [2, 32], strides = [1, 1]} : vector<2x128xf32> to vector<2x32xf32>
    %124 = arith.negf %123 : vector<2x32xf32>
    %125 = math.exp %124 : vector<2x32xf32>
    %cst_35 = arith.constant 1.000000e+00 : f32
    %126 = vector.broadcast %cst_35 : f32 to vector<2x32xf32>
    %127 = arith.addf %126, %125 : vector<2x32xf32>
    %128 = arith.divf %126, %127 : vector<2x32xf32>
    %129 = vector.extract_strided_slice %91 {offsets = [0, 64], sizes = [2, 32], strides = [1, 1]} : vector<2x128xf32> to vector<2x32xf32>
    %130 = math.tanh %129 : vector<2x32xf32>
    %131 = vector.extract_strided_slice %91 {offsets = [0, 96], sizes = [2, 32], strides = [1, 1]} : vector<2x128xf32> to vector<2x32xf32>
    %132 = arith.negf %131 : vector<2x32xf32>
    %133 = math.exp %132 : vector<2x32xf32>
    %cst_36 = arith.constant 1.000000e+00 : f32
    %134 = vector.broadcast %cst_36 : f32 to vector<2x32xf32>
    %135 = arith.addf %134, %133 : vector<2x32xf32>
    %136 = arith.divf %134, %135 : vector<2x32xf32>
    %137 = arith.mulf %128, %79 : vector<2x32xf32>
    %138 = arith.mulf %122, %130 : vector<2x32xf32>
    %139 = arith.addf %137, %138 : vector<2x32xf32>
    %140 = math.tanh %139 : vector<2x32xf32>
    %141 = arith.mulf %136, %140 : vector<2x32xf32>
    %142 = tpu.concatenate %116, %141 in 1 : vector<2x32xf32>, vector<2x32xf32> -> vector<2x64xf32>
    %cst_37 = arith.constant dense<0.000000e+00> : vector<2x256xf32>
    %143 = tpu.matmul %142, %19, %cst_37 {dimension_numbers = #tpu.dot_dimension_numbers<[1], [0], [0], [1], [0, 0, 1, 1], [], []>} : vector<2x64xf32>, vector<64x256xf32>, vector<2x256xf32> -> vector<2x256xf32>
    %144 = vector.extract_strided_slice %143 {offsets = [0, 0], sizes = [2, 128], strides = [1, 1]} : vector<2x256xf32> to vector<2x128xf32>
    %145 = vector.extract_strided_slice %12 {offsets = [0, 2, 0], sizes = [2, 1, 128], strides = [1, 1, 1]} : vector<2x8x128xf32> to vector<2x1x128xf32>
    %146 = vector.shape_cast %145 : vector<2x1x128xf32> to vector<2x128xf32>
    %147 = arith.addf %144, %146 : vector<2x128xf32>
    %148 = vector.extract_strided_slice %143 {offsets = [0, 128], sizes = [2, 128], strides = [1, 1]} : vector<2x256xf32> to vector<2x128xf32>
    %149 = vector.extract_strided_slice %18 {offsets = [0, 5, 0], sizes = [2, 1, 128], strides = [1, 1, 1]} : vector<2x8x128xf32> to vector<2x1x128xf32>
    %150 = vector.shape_cast %149 : vector<2x1x128xf32> to vector<2x128xf32>
    %151 = arith.addf %148, %150 : vector<2x128xf32>
    %152 = vector.extract_strided_slice %147 {offsets = [0, 0], sizes = [2, 32], strides = [1, 1]} : vector<2x128xf32> to vector<2x32xf32>
    %153 = arith.negf %152 : vector<2x32xf32>
    %154 = math.exp %153 : vector<2x32xf32>
    %cst_38 = arith.constant 1.000000e+00 : f32
    %155 = vector.broadcast %cst_38 : f32 to vector<2x32xf32>
    %156 = arith.addf %155, %154 : vector<2x32xf32>
    %157 = arith.divf %155, %156 : vector<2x32xf32>
    %158 = vector.extract_strided_slice %147 {offsets = [0, 32], sizes = [2, 32], strides = [1, 1]} : vector<2x128xf32> to vector<2x32xf32>
    %159 = arith.negf %158 : vector<2x32xf32>
    %160 = math.exp %159 : vector<2x32xf32>
    %cst_39 = arith.constant 1.000000e+00 : f32
    %161 = vector.broadcast %cst_39 : f32 to vector<2x32xf32>
    %162 = arith.addf %161, %160 : vector<2x32xf32>
    %163 = arith.divf %161, %162 : vector<2x32xf32>
    %164 = vector.extract_strided_slice %147 {offsets = [0, 64], sizes = [2, 32], strides = [1, 1]} : vector<2x128xf32> to vector<2x32xf32>
    %165 = math.tanh %164 : vector<2x32xf32>
    %166 = vector.extract_strided_slice %147 {offsets = [0, 96], sizes = [2, 32], strides = [1, 1]} : vector<2x128xf32> to vector<2x32xf32>
    %167 = arith.negf %166 : vector<2x32xf32>
    %168 = math.exp %167 : vector<2x32xf32>
    %cst_40 = arith.constant 1.000000e+00 : f32
    %169 = vector.broadcast %cst_40 : f32 to vector<2x32xf32>
    %170 = arith.addf %169, %168 : vector<2x32xf32>
    %171 = arith.divf %169, %170 : vector<2x32xf32>
    %172 = arith.mulf %163, %114 : vector<2x32xf32>
    %173 = arith.mulf %157, %165 : vector<2x32xf32>
    %174 = arith.addf %172, %173 : vector<2x32xf32>
    %175 = math.tanh %174 : vector<2x32xf32>
    %176 = arith.mulf %171, %175 : vector<2x32xf32>
    %177 = vector.extract_strided_slice %151 {offsets = [0, 0], sizes = [2, 32], strides = [1, 1]} : vector<2x128xf32> to vector<2x32xf32>
    %178 = arith.negf %177 : vector<2x32xf32>
    %179 = math.exp %178 : vector<2x32xf32>
    %cst_41 = arith.constant 1.000000e+00 : f32
    %180 = vector.broadcast %cst_41 : f32 to vector<2x32xf32>
    %181 = arith.addf %180, %179 : vector<2x32xf32>
    %182 = arith.divf %180, %181 : vector<2x32xf32>
    %183 = vector.extract_strided_slice %151 {offsets = [0, 32], sizes = [2, 32], strides = [1, 1]} : vector<2x128xf32> to vector<2x32xf32>
    %184 = arith.negf %183 : vector<2x32xf32>
    %185 = math.exp %184 : vector<2x32xf32>
    %cst_42 = arith.constant 1.000000e+00 : f32
    %186 = vector.broadcast %cst_42 : f32 to vector<2x32xf32>
    %187 = arith.addf %186, %185 : vector<2x32xf32>
    %188 = arith.divf %186, %187 : vector<2x32xf32>
    %189 = vector.extract_strided_slice %151 {offsets = [0, 64], sizes = [2, 32], strides = [1, 1]} : vector<2x128xf32> to vector<2x32xf32>
    %190 = math.tanh %189 : vector<2x32xf32>
    %191 = vector.extract_strided_slice %151 {offsets = [0, 96], sizes = [2, 32], strides = [1, 1]} : vector<2x128xf32> to vector<2x32xf32>
    %192 = arith.negf %191 : vector<2x32xf32>
    %193 = math.exp %192 : vector<2x32xf32>
    %cst_43 = arith.constant 1.000000e+00 : f32
    %194 = vector.broadcast %cst_43 : f32 to vector<2x32xf32>
    %195 = arith.addf %194, %193 : vector<2x32xf32>
    %196 = arith.divf %194, %195 : vector<2x32xf32>
    %197 = arith.mulf %188, %139 : vector<2x32xf32>
    %198 = arith.mulf %182, %190 : vector<2x32xf32>
    %199 = arith.addf %197, %198 : vector<2x32xf32>
    %200 = math.tanh %199 : vector<2x32xf32>
    %201 = arith.mulf %196, %200 : vector<2x32xf32>
    %202 = tpu.concatenate %176, %201 in 1 : vector<2x32xf32>, vector<2x32xf32> -> vector<2x64xf32>
    %cst_44 = arith.constant dense<0.000000e+00> : vector<2x256xf32>
    %203 = tpu.matmul %202, %19, %cst_44 {dimension_numbers = #tpu.dot_dimension_numbers<[1], [0], [0], [1], [0, 0, 1, 1], [], []>} : vector<2x64xf32>, vector<64x256xf32>, vector<2x256xf32> -> vector<2x256xf32>
    %204 = vector.extract_strided_slice %203 {offsets = [0, 0], sizes = [2, 128], strides = [1, 1]} : vector<2x256xf32> to vector<2x128xf32>
    %205 = vector.extract_strided_slice %12 {offsets = [0, 3, 0], sizes = [2, 1, 128], strides = [1, 1, 1]} : vector<2x8x128xf32> to vector<2x1x128xf32>
    %206 = vector.shape_cast %205 : vector<2x1x128xf32> to vector<2x128xf32>
    %207 = arith.addf %204, %206 : vector<2x128xf32>
    %208 = vector.extract_strided_slice %203 {offsets = [0, 128], sizes = [2, 128], strides = [1, 1]} : vector<2x256xf32> to vector<2x128xf32>
    %209 = vector.extract_strided_slice %18 {offsets = [0, 4, 0], sizes = [2, 1, 128], strides = [1, 1, 1]} : vector<2x8x128xf32> to vector<2x1x128xf32>
    %210 = vector.shape_cast %209 : vector<2x1x128xf32> to vector<2x128xf32>
    %211 = arith.addf %208, %210 : vector<2x128xf32>
    %212 = vector.extract_strided_slice %207 {offsets = [0, 0], sizes = [2, 32], strides = [1, 1]} : vector<2x128xf32> to vector<2x32xf32>
    %213 = arith.negf %212 : vector<2x32xf32>
    %214 = math.exp %213 : vector<2x32xf32>
    %cst_45 = arith.constant 1.000000e+00 : f32
    %215 = vector.broadcast %cst_45 : f32 to vector<2x32xf32>
    %216 = arith.addf %215, %214 : vector<2x32xf32>
    %217 = arith.divf %215, %216 : vector<2x32xf32>
    %218 = vector.extract_strided_slice %207 {offsets = [0, 32], sizes = [2, 32], strides = [1, 1]} : vector<2x128xf32> to vector<2x32xf32>
    %219 = arith.negf %218 : vector<2x32xf32>
    %220 = math.exp %219 : vector<2x32xf32>
    %cst_46 = arith.constant 1.000000e+00 : f32
    %221 = vector.broadcast %cst_46 : f32 to vector<2x32xf32>
    %222 = arith.addf %221, %220 : vector<2x32xf32>
    %223 = arith.divf %221, %222 : vector<2x32xf32>
    %224 = vector.extract_strided_slice %207 {offsets = [0, 64], sizes = [2, 32], strides = [1, 1]} : vector<2x128xf32> to vector<2x32xf32>
    %225 = math.tanh %224 : vector<2x32xf32>
    %226 = vector.extract_strided_slice %207 {offsets = [0, 96], sizes = [2, 32], strides = [1, 1]} : vector<2x128xf32> to vector<2x32xf32>
    %227 = arith.negf %226 : vector<2x32xf32>
    %228 = math.exp %227 : vector<2x32xf32>
    %cst_47 = arith.constant 1.000000e+00 : f32
    %229 = vector.broadcast %cst_47 : f32 to vector<2x32xf32>
    %230 = arith.addf %229, %228 : vector<2x32xf32>
    %231 = arith.divf %229, %230 : vector<2x32xf32>
    %232 = arith.mulf %223, %174 : vector<2x32xf32>
    %233 = arith.mulf %217, %225 : vector<2x32xf32>
    %234 = arith.addf %232, %233 : vector<2x32xf32>
    %235 = math.tanh %234 : vector<2x32xf32>
    %236 = arith.mulf %231, %235 : vector<2x32xf32>
    %237 = vector.extract_strided_slice %211 {offsets = [0, 0], sizes = [2, 32], strides = [1, 1]} : vector<2x128xf32> to vector<2x32xf32>
    %238 = arith.negf %237 : vector<2x32xf32>
    %239 = math.exp %238 : vector<2x32xf32>
    %cst_48 = arith.constant 1.000000e+00 : f32
    %240 = vector.broadcast %cst_48 : f32 to vector<2x32xf32>
    %241 = arith.addf %240, %239 : vector<2x32xf32>
    %242 = arith.divf %240, %241 : vector<2x32xf32>
    %243 = vector.extract_strided_slice %211 {offsets = [0, 32], sizes = [2, 32], strides = [1, 1]} : vector<2x128xf32> to vector<2x32xf32>
    %244 = arith.negf %243 : vector<2x32xf32>
    %245 = math.exp %244 : vector<2x32xf32>
    %cst_49 = arith.constant 1.000000e+00 : f32
    %246 = vector.broadcast %cst_49 : f32 to vector<2x32xf32>
    %247 = arith.addf %246, %245 : vector<2x32xf32>
    %248 = arith.divf %246, %247 : vector<2x32xf32>
    %249 = vector.extract_strided_slice %211 {offsets = [0, 64], sizes = [2, 32], strides = [1, 1]} : vector<2x128xf32> to vector<2x32xf32>
    %250 = math.tanh %249 : vector<2x32xf32>
    %251 = vector.extract_strided_slice %211 {offsets = [0, 96], sizes = [2, 32], strides = [1, 1]} : vector<2x128xf32> to vector<2x32xf32>
    %252 = arith.negf %251 : vector<2x32xf32>
    %253 = math.exp %252 : vector<2x32xf32>
    %cst_50 = arith.constant 1.000000e+00 : f32
    %254 = vector.broadcast %cst_50 : f32 to vector<2x32xf32>
    %255 = arith.addf %254, %253 : vector<2x32xf32>
    %256 = arith.divf %254, %255 : vector<2x32xf32>
    %257 = arith.mulf %248, %199 : vector<2x32xf32>
    %258 = arith.mulf %242, %250 : vector<2x32xf32>
    %259 = arith.addf %257, %258 : vector<2x32xf32>
    %260 = math.tanh %259 : vector<2x32xf32>
    %261 = arith.mulf %256, %260 : vector<2x32xf32>
    %262 = tpu.concatenate %236, %261 in 1 : vector<2x32xf32>, vector<2x32xf32> -> vector<2x64xf32>
    %cst_51 = arith.constant dense<0.000000e+00> : vector<2x256xf32>
    %263 = tpu.matmul %262, %19, %cst_51 {dimension_numbers = #tpu.dot_dimension_numbers<[1], [0], [0], [1], [0, 0, 1, 1], [], []>} : vector<2x64xf32>, vector<64x256xf32>, vector<2x256xf32> -> vector<2x256xf32>
    %264 = vector.extract_strided_slice %263 {offsets = [0, 0], sizes = [2, 128], strides = [1, 1]} : vector<2x256xf32> to vector<2x128xf32>
    %265 = vector.extract_strided_slice %12 {offsets = [0, 4, 0], sizes = [2, 1, 128], strides = [1, 1, 1]} : vector<2x8x128xf32> to vector<2x1x128xf32>
    %266 = vector.shape_cast %265 : vector<2x1x128xf32> to vector<2x128xf32>
    %267 = arith.addf %264, %266 : vector<2x128xf32>
    %268 = vector.extract_strided_slice %263 {offsets = [0, 128], sizes = [2, 128], strides = [1, 1]} : vector<2x256xf32> to vector<2x128xf32>
    %269 = vector.extract_strided_slice %18 {offsets = [0, 3, 0], sizes = [2, 1, 128], strides = [1, 1, 1]} : vector<2x8x128xf32> to vector<2x1x128xf32>
    %270 = vector.shape_cast %269 : vector<2x1x128xf32> to vector<2x128xf32>
    %271 = arith.addf %268, %270 : vector<2x128xf32>
    %272 = vector.extract_strided_slice %267 {offsets = [0, 0], sizes = [2, 32], strides = [1, 1]} : vector<2x128xf32> to vector<2x32xf32>
    %273 = arith.negf %272 : vector<2x32xf32>
    %274 = math.exp %273 : vector<2x32xf32>
    %cst_52 = arith.constant 1.000000e+00 : f32
    %275 = vector.broadcast %cst_52 : f32 to vector<2x32xf32>
    %276 = arith.addf %275, %274 : vector<2x32xf32>
    %277 = arith.divf %275, %276 : vector<2x32xf32>
    %278 = vector.extract_strided_slice %267 {offsets = [0, 32], sizes = [2, 32], strides = [1, 1]} : vector<2x128xf32> to vector<2x32xf32>
    %279 = arith.negf %278 : vector<2x32xf32>
    %280 = math.exp %279 : vector<2x32xf32>
    %cst_53 = arith.constant 1.000000e+00 : f32
    %281 = vector.broadcast %cst_53 : f32 to vector<2x32xf32>
    %282 = arith.addf %281, %280 : vector<2x32xf32>
    %283 = arith.divf %281, %282 : vector<2x32xf32>
    %284 = vector.extract_strided_slice %267 {offsets = [0, 64], sizes = [2, 32], strides = [1, 1]} : vector<2x128xf32> to vector<2x32xf32>
    %285 = math.tanh %284 : vector<2x32xf32>
    %286 = vector.extract_strided_slice %267 {offsets = [0, 96], sizes = [2, 32], strides = [1, 1]} : vector<2x128xf32> to vector<2x32xf32>
    %287 = arith.negf %286 : vector<2x32xf32>
    %288 = math.exp %287 : vector<2x32xf32>
    %cst_54 = arith.constant 1.000000e+00 : f32
    %289 = vector.broadcast %cst_54 : f32 to vector<2x32xf32>
    %290 = arith.addf %289, %288 : vector<2x32xf32>
    %291 = arith.divf %289, %290 : vector<2x32xf32>
    %292 = arith.mulf %283, %234 : vector<2x32xf32>
    %293 = arith.mulf %277, %285 : vector<2x32xf32>
    %294 = arith.addf %292, %293 : vector<2x32xf32>
    %295 = math.tanh %294 : vector<2x32xf32>
    %296 = arith.mulf %291, %295 : vector<2x32xf32>
    %297 = vector.extract_strided_slice %271 {offsets = [0, 0], sizes = [2, 32], strides = [1, 1]} : vector<2x128xf32> to vector<2x32xf32>
    %298 = arith.negf %297 : vector<2x32xf32>
    %299 = math.exp %298 : vector<2x32xf32>
    %cst_55 = arith.constant 1.000000e+00 : f32
    %300 = vector.broadcast %cst_55 : f32 to vector<2x32xf32>
    %301 = arith.addf %300, %299 : vector<2x32xf32>
    %302 = arith.divf %300, %301 : vector<2x32xf32>
    %303 = vector.extract_strided_slice %271 {offsets = [0, 32], sizes = [2, 32], strides = [1, 1]} : vector<2x128xf32> to vector<2x32xf32>
    %304 = arith.negf %303 : vector<2x32xf32>
    %305 = math.exp %304 : vector<2x32xf32>
    %cst_56 = arith.constant 1.000000e+00 : f32
    %306 = vector.broadcast %cst_56 : f32 to vector<2x32xf32>
    %307 = arith.addf %306, %305 : vector<2x32xf32>
    %308 = arith.divf %306, %307 : vector<2x32xf32>
    %309 = vector.extract_strided_slice %271 {offsets = [0, 64], sizes = [2, 32], strides = [1, 1]} : vector<2x128xf32> to vector<2x32xf32>
    %310 = math.tanh %309 : vector<2x32xf32>
    %311 = vector.extract_strided_slice %271 {offsets = [0, 96], sizes = [2, 32], strides = [1, 1]} : vector<2x128xf32> to vector<2x32xf32>
    %312 = arith.negf %311 : vector<2x32xf32>
    %313 = math.exp %312 : vector<2x32xf32>
    %cst_57 = arith.constant 1.000000e+00 : f32
    %314 = vector.broadcast %cst_57 : f32 to vector<2x32xf32>
    %315 = arith.addf %314, %313 : vector<2x32xf32>
    %316 = arith.divf %314, %315 : vector<2x32xf32>
    %317 = arith.mulf %308, %259 : vector<2x32xf32>
    %318 = arith.mulf %302, %310 : vector<2x32xf32>
    %319 = arith.addf %317, %318 : vector<2x32xf32>
    %320 = math.tanh %319 : vector<2x32xf32>
    %321 = arith.mulf %316, %320 : vector<2x32xf32>
    %322 = tpu.concatenate %296, %321 in 1 : vector<2x32xf32>, vector<2x32xf32> -> vector<2x64xf32>
    %cst_58 = arith.constant dense<0.000000e+00> : vector<2x256xf32>
    %323 = tpu.matmul %322, %19, %cst_58 {dimension_numbers = #tpu.dot_dimension_numbers<[1], [0], [0], [1], [0, 0, 1, 1], [], []>} : vector<2x64xf32>, vector<64x256xf32>, vector<2x256xf32> -> vector<2x256xf32>
    %324 = vector.extract_strided_slice %323 {offsets = [0, 0], sizes = [2, 128], strides = [1, 1]} : vector<2x256xf32> to vector<2x128xf32>
    %325 = vector.extract_strided_slice %12 {offsets = [0, 5, 0], sizes = [2, 1, 128], strides = [1, 1, 1]} : vector<2x8x128xf32> to vector<2x1x128xf32>
    %326 = vector.shape_cast %325 : vector<2x1x128xf32> to vector<2x128xf32>
    %327 = arith.addf %324, %326 : vector<2x128xf32>
    %328 = vector.extract_strided_slice %323 {offsets = [0, 128], sizes = [2, 128], strides = [1, 1]} : vector<2x256xf32> to vector<2x128xf32>
    %329 = vector.extract_strided_slice %18 {offsets = [0, 2, 0], sizes = [2, 1, 128], strides = [1, 1, 1]} : vector<2x8x128xf32> to vector<2x1x128xf32>
    %330 = vector.shape_cast %329 : vector<2x1x128xf32> to vector<2x128xf32>
    %331 = arith.addf %328, %330 : vector<2x128xf32>
    %332 = vector.extract_strided_slice %327 {offsets = [0, 0], sizes = [2, 32], strides = [1, 1]} : vector<2x128xf32> to vector<2x32xf32>
    %333 = arith.negf %332 : vector<2x32xf32>
    %334 = math.exp %333 : vector<2x32xf32>
    %cst_59 = arith.constant 1.000000e+00 : f32
    %335 = vector.broadcast %cst_59 : f32 to vector<2x32xf32>
    %336 = arith.addf %335, %334 : vector<2x32xf32>
    %337 = arith.divf %335, %336 : vector<2x32xf32>
    %338 = vector.extract_strided_slice %327 {offsets = [0, 32], sizes = [2, 32], strides = [1, 1]} : vector<2x128xf32> to vector<2x32xf32>
    %339 = arith.negf %338 : vector<2x32xf32>
    %340 = math.exp %339 : vector<2x32xf32>
    %cst_60 = arith.constant 1.000000e+00 : f32
    %341 = vector.broadcast %cst_60 : f32 to vector<2x32xf32>
    %342 = arith.addf %341, %340 : vector<2x32xf32>
    %343 = arith.divf %341, %342 : vector<2x32xf32>
    %344 = vector.extract_strided_slice %327 {offsets = [0, 64], sizes = [2, 32], strides = [1, 1]} : vector<2x128xf32> to vector<2x32xf32>
    %345 = math.tanh %344 : vector<2x32xf32>
    %346 = vector.extract_strided_slice %327 {offsets = [0, 96], sizes = [2, 32], strides = [1, 1]} : vector<2x128xf32> to vector<2x32xf32>
    %347 = arith.negf %346 : vector<2x32xf32>
    %348 = math.exp %347 : vector<2x32xf32>
    %cst_61 = arith.constant 1.000000e+00 : f32
    %349 = vector.broadcast %cst_61 : f32 to vector<2x32xf32>
    %350 = arith.addf %349, %348 : vector<2x32xf32>
    %351 = arith.divf %349, %350 : vector<2x32xf32>
    %352 = arith.mulf %343, %294 : vector<2x32xf32>
    %353 = arith.mulf %337, %345 : vector<2x32xf32>
    %354 = arith.addf %352, %353 : vector<2x32xf32>
    %355 = math.tanh %354 : vector<2x32xf32>
    %356 = arith.mulf %351, %355 : vector<2x32xf32>
    %357 = vector.extract_strided_slice %331 {offsets = [0, 0], sizes = [2, 32], strides = [1, 1]} : vector<2x128xf32> to vector<2x32xf32>
    %358 = arith.negf %357 : vector<2x32xf32>
    %359 = math.exp %358 : vector<2x32xf32>
    %cst_62 = arith.constant 1.000000e+00 : f32
    %360 = vector.broadcast %cst_62 : f32 to vector<2x32xf32>
    %361 = arith.addf %360, %359 : vector<2x32xf32>
    %362 = arith.divf %360, %361 : vector<2x32xf32>
    %363 = vector.extract_strided_slice %331 {offsets = [0, 32], sizes = [2, 32], strides = [1, 1]} : vector<2x128xf32> to vector<2x32xf32>
    %364 = arith.negf %363 : vector<2x32xf32>
    %365 = math.exp %364 : vector<2x32xf32>
    %cst_63 = arith.constant 1.000000e+00 : f32
    %366 = vector.broadcast %cst_63 : f32 to vector<2x32xf32>
    %367 = arith.addf %366, %365 : vector<2x32xf32>
    %368 = arith.divf %366, %367 : vector<2x32xf32>
    %369 = vector.extract_strided_slice %331 {offsets = [0, 64], sizes = [2, 32], strides = [1, 1]} : vector<2x128xf32> to vector<2x32xf32>
    %370 = math.tanh %369 : vector<2x32xf32>
    %371 = vector.extract_strided_slice %331 {offsets = [0, 96], sizes = [2, 32], strides = [1, 1]} : vector<2x128xf32> to vector<2x32xf32>
    %372 = arith.negf %371 : vector<2x32xf32>
    %373 = math.exp %372 : vector<2x32xf32>
    %cst_64 = arith.constant 1.000000e+00 : f32
    %374 = vector.broadcast %cst_64 : f32 to vector<2x32xf32>
    %375 = arith.addf %374, %373 : vector<2x32xf32>
    %376 = arith.divf %374, %375 : vector<2x32xf32>
    %377 = arith.mulf %368, %319 : vector<2x32xf32>
    %378 = arith.mulf %362, %370 : vector<2x32xf32>
    %379 = arith.addf %377, %378 : vector<2x32xf32>
    %380 = math.tanh %379 : vector<2x32xf32>
    %381 = arith.mulf %376, %380 : vector<2x32xf32>
    %382 = tpu.concatenate %356, %381 in 1 : vector<2x32xf32>, vector<2x32xf32> -> vector<2x64xf32>
    %cst_65 = arith.constant dense<0.000000e+00> : vector<2x256xf32>
    %383 = tpu.matmul %382, %19, %cst_65 {dimension_numbers = #tpu.dot_dimension_numbers<[1], [0], [0], [1], [0, 0, 1, 1], [], []>} : vector<2x64xf32>, vector<64x256xf32>, vector<2x256xf32> -> vector<2x256xf32>
    %384 = vector.extract_strided_slice %383 {offsets = [0, 0], sizes = [2, 128], strides = [1, 1]} : vector<2x256xf32> to vector<2x128xf32>
    %385 = vector.extract_strided_slice %12 {offsets = [0, 6, 0], sizes = [2, 1, 128], strides = [1, 1, 1]} : vector<2x8x128xf32> to vector<2x1x128xf32>
    %386 = vector.shape_cast %385 : vector<2x1x128xf32> to vector<2x128xf32>
    %387 = arith.addf %384, %386 : vector<2x128xf32>
    %388 = vector.extract_strided_slice %383 {offsets = [0, 128], sizes = [2, 128], strides = [1, 1]} : vector<2x256xf32> to vector<2x128xf32>
    %389 = vector.extract_strided_slice %18 {offsets = [0, 1, 0], sizes = [2, 1, 128], strides = [1, 1, 1]} : vector<2x8x128xf32> to vector<2x1x128xf32>
    %390 = vector.shape_cast %389 : vector<2x1x128xf32> to vector<2x128xf32>
    %391 = arith.addf %388, %390 : vector<2x128xf32>
    %392 = vector.extract_strided_slice %387 {offsets = [0, 0], sizes = [2, 32], strides = [1, 1]} : vector<2x128xf32> to vector<2x32xf32>
    %393 = arith.negf %392 : vector<2x32xf32>
    %394 = math.exp %393 : vector<2x32xf32>
    %cst_66 = arith.constant 1.000000e+00 : f32
    %395 = vector.broadcast %cst_66 : f32 to vector<2x32xf32>
    %396 = arith.addf %395, %394 : vector<2x32xf32>
    %397 = arith.divf %395, %396 : vector<2x32xf32>
    %398 = vector.extract_strided_slice %387 {offsets = [0, 32], sizes = [2, 32], strides = [1, 1]} : vector<2x128xf32> to vector<2x32xf32>
    %399 = arith.negf %398 : vector<2x32xf32>
    %400 = math.exp %399 : vector<2x32xf32>
    %cst_67 = arith.constant 1.000000e+00 : f32
    %401 = vector.broadcast %cst_67 : f32 to vector<2x32xf32>
    %402 = arith.addf %401, %400 : vector<2x32xf32>
    %403 = arith.divf %401, %402 : vector<2x32xf32>
    %404 = vector.extract_strided_slice %387 {offsets = [0, 64], sizes = [2, 32], strides = [1, 1]} : vector<2x128xf32> to vector<2x32xf32>
    %405 = math.tanh %404 : vector<2x32xf32>
    %406 = vector.extract_strided_slice %387 {offsets = [0, 96], sizes = [2, 32], strides = [1, 1]} : vector<2x128xf32> to vector<2x32xf32>
    %407 = arith.negf %406 : vector<2x32xf32>
    %408 = math.exp %407 : vector<2x32xf32>
    %cst_68 = arith.constant 1.000000e+00 : f32
    %409 = vector.broadcast %cst_68 : f32 to vector<2x32xf32>
    %410 = arith.addf %409, %408 : vector<2x32xf32>
    %411 = arith.divf %409, %410 : vector<2x32xf32>
    %412 = arith.mulf %403, %354 : vector<2x32xf32>
    %413 = arith.mulf %397, %405 : vector<2x32xf32>
    %414 = arith.addf %412, %413 : vector<2x32xf32>
    %415 = math.tanh %414 : vector<2x32xf32>
    %416 = arith.mulf %411, %415 : vector<2x32xf32>
    %417 = vector.extract_strided_slice %391 {offsets = [0, 0], sizes = [2, 32], strides = [1, 1]} : vector<2x128xf32> to vector<2x32xf32>
    %418 = arith.negf %417 : vector<2x32xf32>
    %419 = math.exp %418 : vector<2x32xf32>
    %cst_69 = arith.constant 1.000000e+00 : f32
    %420 = vector.broadcast %cst_69 : f32 to vector<2x32xf32>
    %421 = arith.addf %420, %419 : vector<2x32xf32>
    %422 = arith.divf %420, %421 : vector<2x32xf32>
    %423 = vector.extract_strided_slice %391 {offsets = [0, 32], sizes = [2, 32], strides = [1, 1]} : vector<2x128xf32> to vector<2x32xf32>
    %424 = arith.negf %423 : vector<2x32xf32>
    %425 = math.exp %424 : vector<2x32xf32>
    %cst_70 = arith.constant 1.000000e+00 : f32
    %426 = vector.broadcast %cst_70 : f32 to vector<2x32xf32>
    %427 = arith.addf %426, %425 : vector<2x32xf32>
    %428 = arith.divf %426, %427 : vector<2x32xf32>
    %429 = vector.extract_strided_slice %391 {offsets = [0, 64], sizes = [2, 32], strides = [1, 1]} : vector<2x128xf32> to vector<2x32xf32>
    %430 = math.tanh %429 : vector<2x32xf32>
    %431 = vector.extract_strided_slice %391 {offsets = [0, 96], sizes = [2, 32], strides = [1, 1]} : vector<2x128xf32> to vector<2x32xf32>
    %432 = arith.negf %431 : vector<2x32xf32>
    %433 = math.exp %432 : vector<2x32xf32>
    %cst_71 = arith.constant 1.000000e+00 : f32
    %434 = vector.broadcast %cst_71 : f32 to vector<2x32xf32>
    %435 = arith.addf %434, %433 : vector<2x32xf32>
    %436 = arith.divf %434, %435 : vector<2x32xf32>
    %437 = arith.mulf %428, %379 : vector<2x32xf32>
    %438 = arith.mulf %422, %430 : vector<2x32xf32>
    %439 = arith.addf %437, %438 : vector<2x32xf32>
    %440 = math.tanh %439 : vector<2x32xf32>
    %441 = arith.mulf %436, %440 : vector<2x32xf32>
    %442 = tpu.concatenate %416, %441 in 1 : vector<2x32xf32>, vector<2x32xf32> -> vector<2x64xf32>
    %cst_72 = arith.constant dense<0.000000e+00> : vector<2x256xf32>
    %443 = tpu.matmul %442, %19, %cst_72 {dimension_numbers = #tpu.dot_dimension_numbers<[1], [0], [0], [1], [0, 0, 1, 1], [], []>} : vector<2x64xf32>, vector<64x256xf32>, vector<2x256xf32> -> vector<2x256xf32>
    %444 = vector.extract_strided_slice %443 {offsets = [0, 0], sizes = [2, 128], strides = [1, 1]} : vector<2x256xf32> to vector<2x128xf32>
    %445 = vector.extract_strided_slice %12 {offsets = [0, 7, 0], sizes = [2, 1, 128], strides = [1, 1, 1]} : vector<2x8x128xf32> to vector<2x1x128xf32>
    %446 = vector.shape_cast %445 : vector<2x1x128xf32> to vector<2x128xf32>
    %447 = arith.addf %444, %446 : vector<2x128xf32>
    %448 = vector.extract_strided_slice %443 {offsets = [0, 128], sizes = [2, 128], strides = [1, 1]} : vector<2x256xf32> to vector<2x128xf32>
    %449 = vector.extract_strided_slice %18 {offsets = [0, 0, 0], sizes = [2, 1, 128], strides = [1, 1, 1]} : vector<2x8x128xf32> to vector<2x1x128xf32>
    %450 = vector.shape_cast %449 : vector<2x1x128xf32> to vector<2x128xf32>
    %451 = arith.addf %448, %450 : vector<2x128xf32>
    %452 = vector.extract_strided_slice %447 {offsets = [0, 0], sizes = [2, 32], strides = [1, 1]} : vector<2x128xf32> to vector<2x32xf32>
    %453 = arith.negf %452 : vector<2x32xf32>
    %454 = math.exp %453 : vector<2x32xf32>
    %cst_73 = arith.constant 1.000000e+00 : f32
    %455 = vector.broadcast %cst_73 : f32 to vector<2x32xf32>
    %456 = arith.addf %455, %454 : vector<2x32xf32>
    %457 = arith.divf %455, %456 : vector<2x32xf32>
    %458 = vector.extract_strided_slice %447 {offsets = [0, 32], sizes = [2, 32], strides = [1, 1]} : vector<2x128xf32> to vector<2x32xf32>
    %459 = arith.negf %458 : vector<2x32xf32>
    %460 = math.exp %459 : vector<2x32xf32>
    %cst_74 = arith.constant 1.000000e+00 : f32
    %461 = vector.broadcast %cst_74 : f32 to vector<2x32xf32>
    %462 = arith.addf %461, %460 : vector<2x32xf32>
    %463 = arith.divf %461, %462 : vector<2x32xf32>
    %464 = vector.extract_strided_slice %447 {offsets = [0, 64], sizes = [2, 32], strides = [1, 1]} : vector<2x128xf32> to vector<2x32xf32>
    %465 = math.tanh %464 : vector<2x32xf32>
    %466 = vector.extract_strided_slice %447 {offsets = [0, 96], sizes = [2, 32], strides = [1, 1]} : vector<2x128xf32> to vector<2x32xf32>
    %467 = arith.negf %466 : vector<2x32xf32>
    %468 = math.exp %467 : vector<2x32xf32>
    %cst_75 = arith.constant 1.000000e+00 : f32
    %469 = vector.broadcast %cst_75 : f32 to vector<2x32xf32>
    %470 = arith.addf %469, %468 : vector<2x32xf32>
    %471 = arith.divf %469, %470 : vector<2x32xf32>
    %472 = arith.mulf %463, %414 : vector<2x32xf32>
    %473 = arith.mulf %457, %465 : vector<2x32xf32>
    %474 = arith.addf %472, %473 : vector<2x32xf32>
    %475 = math.tanh %474 : vector<2x32xf32>
    %476 = arith.mulf %471, %475 : vector<2x32xf32>
    %477 = vector.extract_strided_slice %451 {offsets = [0, 0], sizes = [2, 32], strides = [1, 1]} : vector<2x128xf32> to vector<2x32xf32>
    %478 = arith.negf %477 : vector<2x32xf32>
    %479 = math.exp %478 : vector<2x32xf32>
    %cst_76 = arith.constant 1.000000e+00 : f32
    %480 = vector.broadcast %cst_76 : f32 to vector<2x32xf32>
    %481 = arith.addf %480, %479 : vector<2x32xf32>
    %482 = arith.divf %480, %481 : vector<2x32xf32>
    %483 = vector.extract_strided_slice %451 {offsets = [0, 32], sizes = [2, 32], strides = [1, 1]} : vector<2x128xf32> to vector<2x32xf32>
    %484 = arith.negf %483 : vector<2x32xf32>
    %485 = math.exp %484 : vector<2x32xf32>
    %cst_77 = arith.constant 1.000000e+00 : f32
    %486 = vector.broadcast %cst_77 : f32 to vector<2x32xf32>
    %487 = arith.addf %486, %485 : vector<2x32xf32>
    %488 = arith.divf %486, %487 : vector<2x32xf32>
    %489 = vector.extract_strided_slice %451 {offsets = [0, 64], sizes = [2, 32], strides = [1, 1]} : vector<2x128xf32> to vector<2x32xf32>
    %490 = math.tanh %489 : vector<2x32xf32>
    %491 = vector.extract_strided_slice %451 {offsets = [0, 96], sizes = [2, 32], strides = [1, 1]} : vector<2x128xf32> to vector<2x32xf32>
    %492 = arith.negf %491 : vector<2x32xf32>
    %493 = math.exp %492 : vector<2x32xf32>
    %cst_78 = arith.constant 1.000000e+00 : f32
    %494 = vector.broadcast %cst_78 : f32 to vector<2x32xf32>
    %495 = arith.addf %494, %493 : vector<2x32xf32>
    %496 = arith.divf %494, %495 : vector<2x32xf32>
    %497 = arith.mulf %488, %439 : vector<2x32xf32>
    %498 = arith.mulf %482, %490 : vector<2x32xf32>
    %499 = arith.addf %497, %498 : vector<2x32xf32>
    %500 = math.tanh %499 : vector<2x32xf32>
    %501 = arith.mulf %496, %500 : vector<2x32xf32>
    %502 = tpu.concatenate %476, %501 in 1 : vector<2x32xf32>, vector<2x32xf32> -> vector<2x64xf32>
    %c0_79 = arith.constant 0 : index
    %c0_80 = arith.constant 0 : index
    %503 = vector.load %arg11[%c0_79, %c0_80] : memref<2x64xf32, #tpu.memory_space<vmem>>, vector<2x64xf32>
    tpu.vector_store %arg11[%c0_79, %c0_80], %502 {strides = array<i32>} : memref<2x64xf32, #tpu.memory_space<vmem>>, vector<2x64xf32>,
    %c0_81 = arith.constant 0 : index
    %c0_82 = arith.constant 0 : index
    %504 = vector.load %arg12[%c0_81, %c0_82] : memref<2x32xf32, #tpu.memory_space<vmem>>, vector<2x32xf32>
    tpu.vector_store %arg12[%c0_81, %c0_82], %474 {strides = array<i32>} : memref<2x32xf32, #tpu.memory_space<vmem>>, vector<2x32xf32>,
    %c0_83 = arith.constant 0 : index
    %c0_84 = arith.constant 0 : index
    %505 = vector.load %arg13[%c0_83, %c0_84] : memref<2x32xf32, #tpu.memory_space<vmem>>, vector<2x32xf32>
    tpu.vector_store %arg13[%c0_83, %c0_84], %499 {strides = array<i32>} : memref<2x32xf32, #tpu.memory_space<vmem>>, vector<2x32xf32>,
    %c1_i32 = arith.constant 1 : i32
    %506 = arith.cmpi eq, %arg0, %c1_i32 : i32
    %507 = arith.extui %506 : i1 to i32
    %c0_i32_85 = arith.constant 0 : i32
    %508 = arith.cmpi ne, %507, %c0_i32_85 : i32
    scf.if %508 {
      %c0_86 = arith.constant 0 : index
      %c0_87 = arith.constant 0 : index
      %509 = vector.load %arg8[%c0_86, %c0_87] : memref<64x128xf32, #tpu.memory_space<vmem>>, vector<64x128xf32>
      %cst_88 = arith.constant dense<0.000000e+00> : vector<2x128xf32>
      %510 = tpu.matmul %502, %509, %cst_88 {dimension_numbers = #tpu.dot_dimension_numbers<[1], [0], [0], [1], [0, 0, 1, 1], [], []>} : vector<2x64xf32>, vector<64x128xf32>, vector<2x128xf32> -> vector<2x128xf32>
      %c0_89 = arith.constant 0 : index
      %c0_90 = arith.constant 0 : index
      %511 = vector.load %arg9[%c0_89, %c0_90] : memref<1x128xf32, #tpu.memory_space<vmem>>, vector<1x128xf32>
      %512 = vector.broadcast %511 : vector<1x128xf32> to vector<2x128xf32>
      %513 = arith.addf %510, %512 : vector<2x128xf32>
      %c0_91 = arith.constant 0 : index
      %c0_92 = arith.constant 0 : index
      %514 = vector.load %arg10[%c0_91, %c0_92] : memref<2x128xf32, #tpu.memory_space<vmem>>, vector<2x128xf32>
      tpu.vector_store %arg10[%c0_91, %c0_92], %513 {strides = array<i32>} : memref<2x128xf32, #tpu.memory_space<vmem>>, vector<2x128xf32>,
    } else {
    }
    return
  }
  func.func @transform_0(%arg0: i32) -> (i32, i32, i32) {
    %c0_i32 = arith.constant 0 : i32
    %c0_i32_0 = arith.constant 0 : i32
    %c0_i32_1 = arith.constant 0 : i32
    return %c0_i32, %arg0, %c0_i32_0 : i32, i32, i32
  }
  func.func @transform_1(%arg0: i32) -> (i32, i32, i32) {
    %c1_i32 = arith.constant 1 : i32
    %0 = arith.subi %c1_i32, %arg0 : i32
    %c0_i32 = arith.constant 0 : i32
    %c0_i32_0 = arith.constant 0 : i32
    %c0_i32_1 = arith.constant 0 : i32
    return %c0_i32, %0, %c0_i32_0 : i32, i32, i32
  }
  func.func @transform_2(%arg0: i32) -> (i32, i32) {
    %c0_i32 = arith.constant 0 : i32
    %c0_i32_0 = arith.constant 0 : i32
    %c0_i32_1 = arith.constant 0 : i32
    return %c0_i32, %c0_i32_0 : i32, i32
  }
  func.func @transform_3(%arg0: i32) -> (i32, i32) {
    %c0_i32 = arith.constant 0 : i32
    %c0_i32_0 = arith.constant 0 : i32
    %c0_i32_1 = arith.constant 0 : i32
    return %c0_i32, %c0_i32_0 : i32, i32
  }
  func.func @transform_4(%arg0: i32) -> (i32, i32) {
    %c0_i32 = arith.constant 0 : i32
    %c0_i32_0 = arith.constant 0 : i32
    %c0_i32_1 = arith.constant 0 : i32
    return %c0_i32, %c0_i32_0 : i32, i32
  }
  func.func @transform_5(%arg0: i32) -> (i32, i32) {
    %c0_i32 = arith.constant 0 : i32
    %c0_i32_0 = arith.constant 0 : i32
    %c0_i32_1 = arith.constant 0 : i32
    return %c0_i32, %c0_i32_0 : i32, i32
  }
  func.func @transform_6(%arg0: i32) -> (i32, i32) {
    %c0_i32 = arith.constant 0 : i32
    %c0_i32_0 = arith.constant 0 : i32
    %c0_i32_1 = arith.constant 0 : i32
    return %c0_i32, %c0_i32_0 : i32, i32
  }
  func.func @transform_7(%arg0: i32) -> (i32, i32) {
    %c0_i32 = arith.constant 0 : i32
    %c0_i32_0 = arith.constant 0 : i32
    %c0_i32_1 = arith.constant 0 : i32
    return %c0_i32, %c0_i32_0 : i32, i32
  }
  func.func @transform_8(%arg0: i32) -> (i32, i32) {
    %c0_i32 = arith.constant 0 : i32
    %c0_i32_0 = arith.constant 0 : i32
    %c0_i32_1 = arith.constant 0 : i32
    return %c0_i32, %c0_i32_0 : i32, i32
  }
  func.func @transform_9(%arg0: i32) -> (i32, i32) {
    %c0_i32 = arith.constant 0 : i32
    %c0_i32_0 = arith.constant 0 : i32
    %c0_i32_1 = arith.constant 0 : i32
    return %c0_i32, %c0_i32_0 : i32, i32
  }
}

</mosaic_0001>

<bundles_post_ra>
// kernel: tpu_custom_call.1
= control target key start
LH: loop header
LB: loop body
LE: loop exit
PB: predicated region body
PF: predicated region fallthrough
CT: control target
= control target key end

     0   :  { %s3496_s0 = inlined_call_operand.hbm [shape: f32[2,16,32], index: 0, kind: input, shape index: {}]   ;;  %s3497_s1 = inlined_call_operand.hbm [shape: f32[2,16,32], index: 1, kind: input, shape index: {}]   ;;  %s3498_s2 = inlined_call_operand.hbm [shape: f32[32,128], index: 2, kind: input, shape index: {}]   ;;  %s3499_s3 = inlined_call_operand.hbm [shape: f32[32,128], index: 3, kind: input, shape index: {}]   ;;  %s3500_s4 = inlined_call_operand.vmem [shape: f32[1,128], index: 4, kind: input, shape index: {}]   ;;  %s3501_s5 = inlined_call_operand.vmem [shape: f32[1,128], index: 5, kind: input, shape index: {}]   ;;  %s3502_s6 = inlined_call_operand.hbm [shape: f32[64,256], index: 6, kind: input, shape index: {}]   ;;  %s3503_s7 = inlined_call_operand.hbm [shape: f32[64,128], index: 7, kind: input, shape index: {}]   ;;  %s3504_s8 = inlined_call_operand.vmem [shape: f32[1,128], index: 8, kind: input, shape index: {}]   ;;  %s3505_s9 = inlined_call_operand.hbm [shape: f32[2,128], index: 9, kind: output, shape index: {}]  }
   0x1   :  { %3517 = sst [smem:[#allocation24_spill]] %s3500_s4 }
   0x2   :  { %3518 = sst [smem:[#allocation25_spill]] %s3501_s5 }
   0x3   :  { %3519 = sst [smem:[#allocation26_spill]] %s3504_s8 }
   0x4   :  { %3520 = sst [smem:[#allocation27_spill]] %s3505_s9 }
   0x5   :  { %14 = vsyncpa [#allocation6], 0 }
   0x6   :  { %16 = vsyncpa [#allocation6 + $0x1], 0 }
   0x7   :  { %17 = vsyncpa [#allocation9], 0 }
   0x8   :  { %19 = vsyncpa [#allocation9 + $0x1], 0 }
   0x9   :  { %20 = vsyncpa [#allocation12], 0 }
   0xa   :  { %21 = vsyncpa [#allocation15], 0 }
   0xb   :  { %22 = vsyncpa [#allocation7], 0  ;;  %s2895_s30 = smov 0   ;;  %s2897_s10 = smov 0  }
   0xc   :  { %s2899_s11 = smov 0   ;;  %s2901_s12 = smov 0  }
   0xd   :  { %s2903_s13 = smov 0   ;;  %s2905_s14 = smov 0  }
   0xe   :  { %s2907_s15 = smov 0  }
   0xf LB: > { %s2927_s16 = sadd.s32 4294967295, %s2824_s15   ;;  %p48_p0 = scmp.ne.s32.totalorder %s2816_s13, %s2812_s12  ;;  %s2824_s15 = sphi %s2907_s15, %s3553_s15   ;;  %s2820_s14 = sphi %s2905_s14, %s3552_s14   ;;  %s2816_s13 = sphi %s2903_s13, %s3551_s13   ;;  %s2812_s12 = sphi %s2901_s12, %s3550_s12   ;;  %s2808_s11 = sphi %s2899_s11, %s3549_s11   ;;  %s2804_s10 = sphi %s2897_s10, %s3548_s10   ;;  %s2800_s30 = sphi %s2895_s30, %s3547_s30  }
  0x10   : > { %p3506_p1 = scmp.eq.s32.totalorder %s2927_s16, 0  ;;  %p76_p2 = scmp.ne.s32.totalorder %s2804_s10, %s2800_s30 }
  0x11   : > { %p2019_p3 = scmp.ge.s32.totalorder %s2824_s15, 1  ;;  %p255_p4 = scmp.lt.s32.totalorder %s2824_s15, 3 }
  0x12   : > { %p2936_p5 = por %p3506_p1, %p48_p0  ;;  %p2942_p6 = por %p76_p2, %p3506_p1 }
  0x13   : > { %p2946_p7 = pnand %p2019_p3, %p255_p4  ;;  %s2826_s20 = smov [#allocation10]  }
  0x14   : > { %s3521_s17 = scalar_select %p2936_p5, 1, 0 }
  0x15   : > { %s3522_s18 = scalar_select %p2942_p6, 1, 0 }
  0x16   : > { %s3524_s19 = scalar_select %p2946_p7, 1, 0 }
  0x17   : > { %3523 = sst [smem:[#allocation23_spill]] %s3522_s18  ;;  %p2316_p9 = pneg %p2946_p7 }
  0x18   : > { %s267_s21 = sshll.u32 %s2826_s20, 4  ;;  %s2827_s23 = smov [#allocation11]   ;;  %s268_s21 = int_to_ptr.vmem [resolvable:$true] %s267_s21 }
  0x19   : > { %p2955_p10 = pnand %p2316_p9, %p3506_p1  ;;  %s280_s24 = sshll.u32 %s2827_s23, 4  ;;  %s281_s24 = int_to_ptr.vmem [resolvable:$true] %s280_s24 }
  0x1a   : > { %s2548_s27 = scalar_lea.hbm %s3498_s2, 512 }
  0x1b   : > { %p2549_p11 = scmp.ne.s32.totalorder %s3498_s2, %s2548_s27  ;;  %p2967_p12 = pneg %p2955_p10 }
  0x1c   : > { %p2555_p2 = scmp.lt.u32.totalorder %s2548_s27, %s3498_s2 }
  0x1d   : > { %p2551_p13 = pnand %p2967_p12, %p2549_p11 }
  0x1f   : > { %p2552_p0 = pneg %p2551_p13 }
  0x21   : > { %p2557_p3 = pnand %p2555_p2, %p2552_p0 }
  0x23   : > { %2560 = shalt.err (!%p2557_p3)
}
  0x24   : > { %s2561_s23 = scalar_lea.vmem %s268_s21, 512  ;;  %p2569_p1 = scmp.lt.s32.totalorder %s268_s21, %s268_s21 }
  0x25   : > { %p2562_p4 = scmp.ne.s32.totalorder %s268_s21, %s2561_s23  ;;  %p2570_p6 = scmp.lt.s32.totalorder %s2561_s23, %s2561_s23 }
  0x27   : > { %p2564_p9 = pnand %p2562_p4, %p2967_p12  ;;  %p2571_p5 = por %p2570_p6, %p2569_p1 }
  0x29   : > { %p2565_p8 = pneg %p2564_p9 }
  0x2b   : > { %p2572_p7 = pnand %p2571_p5, %p2565_p8 }
  0x2d   : > { %2575 = shalt.err (!%p2572_p7)
}
  0x2e   : > { %s3513_s25 = smov 128   ;;  %s2829_s26 = smov 8  }
  0x2f   : > { %2319 = dma.hbm_to_vmem [thread:$0]  (!%p2955_p10), %s3498_s2, 512, %s268_s21, [#allocation9], %s3513_s25, %s3513_s25, %s2829_s26  }
  0x30   : > { %s2830_s29 = smov [#allocation13]   ;;  %s2576_s9 = scalar_lea.hbm %s3499_s3, 512 }
  0x31   : > { %s299_s12 = sshll.u32 %s2830_s29, 4  ;;  %p2577_p1 = scmp.ne.s32.totalorder %s3499_s3, %s2576_s9  ;;  %s300_s12 = int_to_ptr.vmem [resolvable:$true] %s299_s12 }
  0x32   : > { %p2583_p7 = scmp.lt.u32.totalorder %s2576_s9, %s3499_s3 }
  0x33   : > { %p2579_p5 = pnand %p2577_p1, %p2967_p12 }
  0x35   : > { %p2580_p6 = pneg %p2579_p5 }
  0x37   : > { %p2585_p8 = pnand %p2583_p7, %p2580_p6 }
  0x39   : > { %2588 = shalt.err (!%p2585_p8)
}
  0x3a   : > { %s2589_s21 = scalar_lea.vmem %s281_s24, 512  ;;  %p2597_p2 = scmp.lt.s32.totalorder %s281_s24, %s281_s24 }
  0x3b   : > { %p2590_p11 = scmp.ne.s32.totalorder %s281_s24, %s2589_s21  ;;  %p2598_p3 = scmp.lt.s32.totalorder %s2589_s21, %s2589_s21 }
  0x3d   : > { %p2592_p13 = pnand %p2590_p11, %p2967_p12  ;;  %p2599_p4 = por %p2598_p3, %p2597_p2 }
  0x3f   : > { %p2593_p0 = pneg %p2592_p13 }
  0x41   : > { %p2600_p9 = pnand %p2599_p4, %p2593_p0 }
  0x43   : > { %2603 = shalt.err (!%p2600_p9)
}
  0x44   : > { %2322 = dma.hbm_to_vmem [thread:$0]  (!%p2955_p10), %s3499_s3, 512, %s281_s24, [#allocation12], %s3513_s25, %s3513_s25, %s2829_s26  }
  0x45   : > { %s2604_s18 = scalar_lea.hbm %s3502_s6, 2048 }
  0x46   : > { %p2605_p1 = scmp.ne.s32.totalorder %s3502_s6, %s2604_s18  ;;  %p2611_p7 = scmp.lt.u32.totalorder %s2604_s18, %s3502_s6 }
  0x48   : > { %p2607_p5 = pnand %p2605_p1, %p2967_p12 }
  0x4a   : > { %p2608_p6 = pneg %p2607_p5 }
  0x4c   : > { %p2613_p8 = pnand %p2611_p7, %p2608_p6 }
  0x4e   : > { %2616 = shalt.err (!%p2613_p8)
}
  0x4f   : > { %s2617_s23 = scalar_lea.vmem %s300_s12, 2048  ;;  %p2625_p2 = scmp.lt.s32.totalorder %s300_s12, %s300_s12 }
  0x50   : > { %p2618_p11 = scmp.ne.s32.totalorder %s300_s12, %s2617_s23  ;;  %p2626_p3 = scmp.lt.s32.totalorder %s2617_s23, %s2617_s23 }
  0x52   : > { %p2620_p13 = pnand %p2618_p11, %p2967_p12  ;;  %p2627_p4 = por %p2626_p3, %p2625_p2 }
  0x54   : > { %p2621_p0 = pneg %p2620_p13 }
  0x56   : > { %p2628_p9 = pnand %p2627_p4, %p2621_p0 }
  0x58   : > { %2631 = shalt.err (!%p2628_p9)
}
  0x59   : > { %s3516_s24 = smov 256   ;;  %s2832_s21 = smov 16  }
  0x5a   : > { %2325 = dma.hbm_to_vmem [thread:$0]  (!%p2955_p10), %s3502_s6, 2048, %s300_s12, [#allocation12], %s3516_s24, %s3516_s24, %s2832_s21  }
  0x5b   : > { %s2833_s8 = smov [#allocation14]   ;;  %s2632_s28 = scalar_lea.hbm %s3503_s7, 1024 }
  0x5c   : > { %s312_s9 = sshll.u32 %s2833_s8, 4  ;;  %p2633_p1 = scmp.ne.s32.totalorder %s3503_s7, %s2632_s28  ;;  %s313_s9 = int_to_ptr.vmem [resolvable:$true] %s312_s9 }
  0x5d   : > { %p2639_p7 = scmp.lt.u32.totalorder %s2632_s28, %s3503_s7 }
  0x5e   : > { %p2635_p5 = pnand %p2633_p1, %p2967_p12 }
  0x60   : > { %p2636_p6 = pneg %p2635_p5 }
  0x62   : > { %p2641_p8 = pnand %p2639_p7, %p2636_p6 }
  0x64   : > { %2644 = shalt.err (!%p2641_p8)
}
  0x65   : > { %s2645_s12 = scalar_lea.vmem %s313_s9, 1024  ;;  %p2653_p2 = scmp.lt.s32.totalorder %s313_s9, %s313_s9 }
  0x66   : > { %p2646_p11 = scmp.ne.s32.totalorder %s313_s9, %s2645_s12  ;;  %p2654_p3 = scmp.lt.s32.totalorder %s2645_s12, %s2645_s12 }
  0x68   : > { %p2648_p13 = pnand %p2646_p11, %p2967_p12  ;;  %p2655_p4 = por %p2654_p3, %p2653_p2 }
  0x6a   : > { %p2649_p0 = pneg %p2648_p13 }
  0x6c   : > { %p2656_p9 = pnand %p2655_p4, %p2649_p0 }
  0x6e   : > { %2659 = shalt.err (!%p2656_p9)
}
  0x6f   : > { %s3527_s21 = smov 128   ;;  %s35_s30 = sadd.s32 1, %s2820_s14 }
  0x70   : > { %2328 = dma.hbm_to_vmem [thread:$0]  (!%p2955_p10), %s3503_s7, 1024, %s313_s9, [#allocation15], %s3527_s21, %s3527_s21, %s2829_s26  }
  0x71   : > { %p42_p12 = scmp.ne.s32.totalorder %s2820_s14, %s2816_s13  ;;  %p43_p1 = scmp.eq.s32.totalorder %s2824_s15, 0 }
  0x72   : > { %p3515_p5 = scmp.lt.s32.totalorder %s2824_s15, 2  ;;  %s329_s22 = sand.u32 1, %s2820_s14  }
  0x73   : > { %s2026_s5 = sshll.u32 %s2824_s15, 7  ;;  %p44_p6 = por %p43_p1, %p42_p12 }
  0x74   : > { %s2025_s8 = sshll.u32 %s329_s22, 4  ;;  %s3060_s28 = scalar_lea.hbm %s3496_s0, %s2026_s5 }
  0x75   : > { %p3064_p10 = pnand %p3515_p5, %p44_p6  ;;  %s333_s29 = scalar_lea.vmem [#allocation5], %s2025_s8 }
  0x76   : > { %s339_s20 = sshll.u32 %s333_s29, 4  ;;  %s3070_s23 = scalar_lea.sflag [#allocation6], %s329_s22  ;;  %s3068_s20 = int_to_ptr.vmem [resolvable:$true] %s339_s20 }
  0x77   : > { %s2660_s12 = scalar_lea.hbm %s3060_s28, 256  ;;  %p2662_p8 = pneg %p3064_p10 }
  0x78   : > { %p2661_p7 = scmp.ne.s32.totalorder %s3060_s28, %s2660_s12  ;;  %s2665_s5 = scalar_lea.hbm %s3496_s0, 512 }
  0x79   : > { %p2666_p0 = scmp.lt.u32.totalorder %s3060_s28, %s3496_s0  ;;  %p2667_p2 = scmp.lt.u32.totalorder %s2665_s5, %s2660_s12 }
  0x7a   : > { %p2663_p11 = pnand %p2662_p8, %p2661_p7  ;;  %p2669_p4 = scmp.lt.u32.totalorder %s2660_s12, %s3060_s28 }
  0x7b   : > { %p2668_p3 = por %p2667_p2, %p2666_p0 }
  0x7c   : > { %p2664_p13 = pneg %p2663_p11 }
  0x7d   : > { %p2670_p9 = por %p2669_p4, %p2668_p3 }
  0x7f   : > { %p2671_p12 = pnand %p2670_p9, %p2664_p13 }
  0x81   : > { %2674 = shalt.err (!%p2671_p12)
}
  0x82   : > { %s2675_s22 = scalar_lea.vmem %s3068_s20, 256  ;;  %s2834_s8 = smov [#allocation5]  }
  0x83   : > { %p2676_p6 = scmp.ne.s32.totalorder %s3068_s20, %s2675_s22  ;;  %s2680_s29 = sshll.u32 %s2834_s8, 4  ;;  %s2681_s29 = int_to_ptr.vmem [resolvable:$false] %s2680_s29 }
  0x84   : > { %s2682_s25 = scalar_lea.vmem %s2681_s29, 512  ;;  %p2683_p5 = scmp.lt.s32.totalorder %s3068_s20, %s2681_s29 }
  0x85   : > { %p2678_p7 = pnand %p2676_p6, %p2662_p8  ;;  %p2684_p0 = scmp.lt.s32.totalorder %s2682_s25, %s2675_s22 }
  0x87   : > { %p2679_p11 = pneg %p2678_p7  ;;  %p2685_p2 = por %p2684_p0, %p2683_p5 }
  0x89   : > { %p2686_p3 = pnand %p2685_p2, %p2679_p11 }
  0x8b   : > { %2689 = shalt.err (!%p2686_p3)
}
  0x8c   : > { %2332 = dma.hbm_to_vmem [thread:$0]  (!%p3064_p10), %s3060_s28, 256, %s3068_s20, %s3070_s23, %s3516_s24, %s3527_s21, %s2829_s26  }
  0x8d   : > { %s3102_s9 = sadd.s32 1, %s2824_s15   ;;  %s58_s4 = ssub.s32 1, %s2824_s15 }
  0x8e   : > { %s32_s12 = ssub.s32 %s2824_s15, %s3102_s9  ;;  %s59_s5 = ssub.s32 1, %s3102_s9 }
  0x8f   : > { %p33_p5 = scmp.eq.s32.totalorder %s32_s12, 0  ;;  %s60_s18 = ssub.s32 %s58_s4, %s59_s5 }
  0x90   : > { %s63_s27 = sadd.s32 1, %s2808_s11  ;;  %p61_p8 = scmp.eq.s32.totalorder %s60_s18, 0 }
  0x91   : > { %s3112_s22 = scalar_select %p33_p5, %s2820_s14, %s35_s30  }
  0x92   : > { %p70_p13 = scmp.ne.s32.totalorder %s2808_s11, %s2804_s10  ;;  %s349_s8 = sand.u32 1, %s2824_s15  }
  0x93   : > { %s351_s29 = sand.u32 1, %s2808_s11   ;;  %s2028_s20 = sshll.u32 %s58_s4, 7 }
  0x94   : > { %s3119_s25 = scalar_select %p61_p8, %s2808_s11, %s63_s27  }
  0x95   : > { %p72_p10 = por %p70_p13, %p43_p1  ;;  %s2027_s28 = sshll.u32 %s351_s29, 4 }
  0x96   : > { %s3126_s12 = scalar_lea.hbm %s3497_s1, %s2028_s20  ;;  %s353_s30 = scalar_lea.vmem [#allocation8], %s2027_s28 }
  0x97   : > { %s360_s5 = sshll.u32 %s353_s30, 4  ;;  %p3529_p4 = scmp.lt.s32.totalorder %s2824_s15, 2  ;;  %s3134_s5 = int_to_ptr.vmem [resolvable:$true] %s360_s5 }
  0x98   : > { %s3136_s4 = scalar_lea.sflag [#allocation9], %s349_s8  ;;  %s2690_s24 = scalar_lea.hbm %s3126_s12, 256 }
  0x99   : > { %p3130_p9 = pnand %p3529_p4, %p72_p10  ;;  %p2691_p1 = scmp.ne.s32.totalorder %s3126_s12, %s2690_s24 }
  0x9a   : > { %s2695_s29 = scalar_lea.hbm %s3497_s1, 512  ;;  %p2696_p11 = scmp.lt.u32.totalorder %s3126_s12, %s3497_s1 }
  0x9b   : > { %p2692_p12 = pneg %p3130_p9  ;;  %p2697_p0 = scmp.lt.u32.totalorder %s2695_s29, %s2690_s24 }
  0x9c   : > { %p2699_p3 = scmp.lt.u32.totalorder %s2690_s24, %s3126_s12 }
  0x9d   : > { %p2693_p6 = pnand %p2692_p12, %p2691_p1  ;;  %p2698_p2 = por %p2697_p0, %p2696_p11 }
  0x9f   : > { %p2694_p7 = pneg %p2693_p6  ;;  %p2700_p5 = por %p2699_p3, %p2698_p2 }
  0xa1   : > { %p2701_p8 = pnand %p2700_p5, %p2694_p7 }
  0xa3   : > { %2704 = shalt.err (!%p2701_p8)
}
  0xa4   : > { %s2705_s8 = scalar_lea.vmem %s3134_s5, 256  ;;  %s2835_s23 = smov [#allocation8]  }
  0xa5   : > { %p2706_p13 = scmp.ne.s32.totalorder %s3134_s5, %s2705_s8  ;;  %s2710_s30 = sshll.u32 %s2835_s23, 4  ;;  %s2711_s30 = int_to_ptr.vmem [resolvable:$false] %s2710_s30 }
  0xa6   : > { %s2712_s27 = scalar_lea.vmem %s2711_s30, 512  ;;  %p2713_p1 = scmp.lt.s32.totalorder %s3134_s5, %s2711_s30 }
  0xa7   : > { %p2708_p10 = pnand %p2706_p13, %p2692_p12  ;;  %p2714_p6 = scmp.lt.s32.totalorder %s2712_s27, %s2705_s8 }
  0xa9   : > { %p2709_p4 = pneg %p2708_p10  ;;  %p2715_p11 = por %p2714_p6, %p2713_p1 }
  0xab   : > { %p2716_p0 = pnand %p2715_p11, %p2709_p4 }
  0xad   : > { %2719 = shalt.err (!%p2716_p0)
}
  0xae   : > { %s3531_s24 = smov 256   ;;  %p3532_p12 = scmp.ne.s32.totalorder %s3524_s19, 0 }
  0xaf   : > { %2335 = dma.hbm_to_vmem [thread:$0]  (!%p3130_p9), %s3126_s12, 256, %s3134_s5, %s3136_s4, %s3531_s24, %s3527_s21, %s2829_s26  }
  0xb0   : > { %372 = sbr.rel (%p3532_p12) target bundleno = 6119 (0x17e7), region = 56  ;;  %s374_s15 = sand.u32 (!%p3532_p12), 1, %s2816_s13  }
  0xb1   : > { %s3170_s29 = sshll.u32 (!%p3532_p12), %s374_s15, 4  ;;  %s375_s28 = scalar_lea.sflag (!%p3532_p12), [#allocation6], %s374_s15 }
  0xb2   : > { %s378_s20 = scalar_lea.vmem (!%p3532_p12), [#allocation5], %s3170_s29  ;;  %p3533_p7 = scmp.ne.s32.totalorder (!%p3532_p12), %s3521_s17, 0 }
  0xb7   : > { %2775 = dma.done.wait (%p3533_p7), %s375_s28, 256  }
  0xb8   : > { %2777 = vsyncadd (%p3533_p7), %s375_s28, 4294967040  ;;  %s3534_s18 = sld [smem:[#allocation23_spill]]  ;;  %s383_s26 = sand.u32 1, %s2927_s16  }
  0xb9   : > { %s385_s21 = sand.u32 1, %s2804_s10   ;;  %s384_s12 = scalar_lea.sflag [#allocation9], %s383_s26 }
  0xba   : > { %s3179_s19 = sshll.u32 %s385_s21, 4 }
  0xbb   : > { %s387_s5 = scalar_lea.vmem [#allocation8], %s3179_s19 }
  0xbe   : > { %p3535_p9 = scmp.ne.s32.totalorder %s3534_s18, 0 }
  0xc0   : > { %2779 = dma.done.wait (%p3535_p9), %s384_s12, 256  }
  0xc1   : > { %2781 = vsyncadd (%p3535_p9), %s384_s12, 4294967040  ;;  %p3536_p2 = scmp.eq.s32.totalorder %s2927_s16, 0 }
  0xc3   : > { %2783 = dma.done.wait (%p3536_p2), [#allocation9], 512   ;;  %p3537_p3 = pmov %p3536_p2 }
  0xc4   : > { %p3538_p5 = pmov %p3536_p2 }
  0xc5   : > { %2785 = vsyncadd (%p3537_p3), [#allocation9], 4294966784 }
  0xc6   : > { %2787 = dma.done.wait (%p3538_p5), [#allocation12], 2560   ;;  %p3539_p8 = pmov %p3536_p2 }
  0xc7   : > { %p3540_p13 = pmov %p3536_p2 }
  0xc8   : > { %2789 = vsyncadd (%p3539_p8), [#allocation12], 4294964736 }
  0xc9   : > { %2791 = dma.done.wait (%p3540_p13), [#allocation15], 1024   ;;  %p3541_p10 = pmov %p3536_p2 }
  0xca   : > { %p3542_p4 = scmp.ne.s32.totalorder %s2927_s16, 0 }
  0xcb   : > { %2793 = vsyncadd (%p3541_p10), [#allocation15], 4294966272  ;;  %vm443_vm0 = vcmask (!%p3542_p4), 517120   ;;  %vm445_vm1 = vcmask (!%p3542_p4), 254976   ;;  %v2836_v0 = vmov (!%p3542_p4), 0.0  }
  0xcc   : > { %442 = sbr.rel (%p3542_p4) target bundleno = 211 (0xd3), region = 84  ;;  %444 = vst.msk [vmem:[#allocation2] sm:$0x3] (!%p3542_p4), %vm443_vm0, %v2836_v0 }
  0xcd   : > { %446 = vst.msk [vmem:[#allocation3] sm:$0x3] (!%p3542_p4), %vm445_vm1, %v2836_v0  ;;  %447 = vst.msk [vmem:[#allocation4] sm:$0x3] (!%p3542_p4), %vm445_vm1, %v2836_v0 }
  0xd3 PF: > { %v452_v1 = vld [vmem:[#allocation10] sm:$0xff]  ;;  %v453_v2 = vld [vmem:[#allocation10 + $0x8] sm:$0xff]  ;;  %v454_v3 = vld [vmem:[#allocation10 + $0x10] sm:$0xff]  ;;  %vm463_vm2 = vcmask 261120   ;;  %s2837_s17 = smov 32   ;;  %v2838_v33 = vmov 0.0  }
  0xd4   : > { %v2136_v4 = vpack.c.bf16 %v453_v2, %v452_v1  ;;  %v455_v5 = vld [vmem:[#allocation10 + $0x18] sm:$0xff]  ;;  %v448_v6 = vld [vmem:[%s378_s20] sm:$0xff]  ;;  %v638_v8 = vld [vmem:[#allocation13 + $0x8] sm:$0xff]  ;;  %vm656_vm3 = vcmask 523264   ;;  %s3543_s23 = sld [smem:[#allocation24_spill]]  ;;  %s3544_s24 = sld [smem:[#allocation25_spill]] }
  0xd5   : > { %v2140_v7 = vpack.c.bf16 %v455_v5, %v454_v3  ;;  %2103 = vmatprep.mubr.msk.f32.mxu0 %vm463_vm2, %v448_v6  ;;  %v640_v9 = vld [vmem:[#allocation13 + $0x18] sm:$0xff]  ;;  %v545_v10 = vld [vmem:[#allocation11] sm:$0xff]  ;;  %v546_v11 = vld [vmem:[#allocation11 + $0x8] sm:$0xff]  ;;  %vm734_vm4 = vcmask 1041409   ;;  %s2839_s15 = smov 64   ;;  %s2840_s29 = smov 96  }
  0xd6   : > { %2137 = vmatprep.subr.bf16.mxu0 %v2136_v4  ;;  %v637_v12 = vld [vmem:[#allocation13] sm:$0xff]  ;;  %v2144_v13 = vpack.c.bf16 %v546_v11, %v545_v10  ;;  %v3203_v14 = vpack.c.bf16 %v640_v9, %v638_v8  ;;  %v639_v15 = vld [vmem:[#allocation13 + $0x10] sm:$0xff]  ;;  %v548_v17 = vld [vmem:[#allocation11 + $0x18] sm:$0xff]  ;;  %vm1794_vm5 = vcmask 517120   ;;  %vm1800_vm6 = vcmask 254976   ;;  %p2067_p1 = scmp.ne.s32.totalorder %s2927_s16, 1 }
  0xd7   : > { %2139 = vmatpush3.bf16.msra.mxu0 %v2136_v4  ;;  %v547_v16 = vld [vmem:[#allocation11 + $0x10] sm:$0xff]  ;;  %v642_v18 = vld [vmem:[#allocation13 + $0x28] sm:$0xff]  ;;  %v644_v19 = vld [vmem:[#allocation13 + $0x38] sm:$0xff]  ;;  %v3209_v23 = vpack.c.bf16 %v639_v15, %v637_v12  ;;  %vm2842_vm7 = vmmov (!%p2067_p1), 0   ;;  %s3545_s18 = sld [smem:[#allocation26_spill]] (!%p2067_p1) }
  0xd8   : > { %2141 = vmatprep.subr.bf16.mxu0 %v2140_v7  ;;  %2145 = vmatprep.subr.bf16.mxu1 %v2144_v13  ;;  %v2148_v20 = vpack.c.bf16 %v548_v17, %v547_v16  ;;  %v450_v21 = vld [vmem:[%s387_s5] sm:$0xff]  ;;  %v449_v22 = vld [vmem:[%s378_s20 + $0x8] sm:$0xff]  ;;  %v3212_v24 = vpack.c.bf16 %v644_v19, %v642_v18 }
  0xd9   : > { %2147 = vmatpush3.bf16.msra.mxu1 %v2144_v13  ;;  %v641_v25 = vld [vmem:[#allocation13 + $0x20] sm:$0xff]  ;;  %v643_v26 = vld [vmem:[#allocation13 + $0x30] sm:$0xff]  ;;  %2114 = vmatprep.mubr.msk.f32.mxu1 %vm463_vm2, %v450_v21  ;;  %v654_v27 = vld [vmem:[#allocation3] sm:$0x3] }
  0xda   : > { %2149 = vmatprep.subr.bf16.mxu1 %v2148_v20  ;;  %v646_v28 = vld [vmem:[#allocation13 + $0x48] sm:$0xff]  ;;  %v648_v29 = vld [vmem:[#allocation13 + $0x58] sm:$0xff]  ;;  %753 = vrot.lane.b32.xlu1 %v654_v27, %s2837_s17  ;;  %v3220_v32 = vpack.c.bf16 %v643_v26, %v641_v25  ;;  %v645_v35 = vld [vmem:[#allocation13 + $0x40] sm:$0xff] }
  0xdb   : > { %2143 = vmatpush3.bf16.msra.mxu0 %v2140_v7  ;;  %v451_v30 = vld [vmem:[%s387_s5 + $0x8] sm:$0xff]  ;;  %v3224_v34 = vpack.c.bf16 %v648_v29, %v646_v28  ;;  %v647_v36 = vld [vmem:[#allocation13 + $0x50] sm:$0xff]  ;;  %v649_v41 = vld [vmem:[#allocation13 + $0x60] sm:$0xff] }
  0xdc   : > { %2153 = vmatprep.subr.bf16.mxu0 %v3203_v14  ;;  %v655_v31 = vld [vmem:[#allocation4] sm:$0x3]  ;;  %v650_v37 = vld [vmem:[#allocation13 + $0x68] sm:$0xff]  ;;  %v3232_v39 = vpack.c.bf16 %v647_v36, %v645_v35  ;;  %v651_v42 = vld [vmem:[#allocation13 + $0x70] sm:$0xff] }
  0xdd   : > { %2151 = vmatpush3.bf16.msra.mxu1 %v2148_v20  ;;  %v652_v38 = vld [vmem:[#allocation13 + $0x78] sm:$0xff]  ;;  %v3240_v43 = vpack.c.bf16 %v651_v42, %v649_v41 }
  0xde   : > { %2104 = vmatmul.mubr.msk.f32.vlgmr.msra.gmra.mrb[0].mxu0 %vm463_vm2, %v449_v22  ;;  %2169 = vmatprep.subr.bf16.mxu1 %v3203_v14  ;;  %v3236_v40 = vpack.c.bf16 %v652_v38, %v650_v37  ;;  %v653_v44 = vld [vmem:[#allocation2] sm:$0x3] }
  0xdf   : > { %2155 = vmatpush1.bf16.msra.mxu0 %v3209_v23  ;;  %724 = vmatprep.mubr.f32.mxu0 %v2838_v33  ;;  %v2037_v45 = vld [vmem:[%s3543_s23] ss:$0 sm:$0xff] }
  0xe0   : > { %2157 = vmatprep.subr.bf16.mxu0 %v3212_v24  ;;  %2115 = vmatmul.mubr.msk.f32.vlgmr.msra.gmra.mrb[0].mxu1 %vm463_vm2, %v451_v30  ;;  %v2040_v49 = vld [vmem:[%s3544_s24] ss:$0 sm:$0xff] }
  0xe1   : > { %781 = vrot.lane.b32.xlu1 %v655_v31, %s2837_s17  ;;  %2171 = vmatpush1.bf16.msra.mxu1 %v3209_v23 }
  0xe2   : > { %877 = vmatprep.mubr.f32.mxu1 %v2838_v33  ;;  %2173 = vmatprep.subr.bf16.mxu1 %v3212_v24 }
  0xe3   : > { %2159 = vmatpush1.bf16.msra.mxu0 %v3220_v32 }
  0xe4   : > { %2161 = vmatprep.subr.bf16.mxu0 %v3224_v34 }
  0xe5   : > { %2175 = vmatpush1.bf16.msra.mxu1 %v3220_v32 }
  0xe6   : > { %2177 = vmatprep.subr.bf16.mxu1 %v3224_v34 }
  0xe7   : > { %2163 = vmatpush1.bf16.msra.mxu0 %v3232_v39 }
  0xe8   : > { %2165 = vmatprep.subr.bf16.mxu0 %v3236_v40 }
  0xe9   : > { %2179 = vmatpush1.bf16.msra.mxu1 %v3232_v39 }
  0xea   : > { %2181 = vmatprep.subr.bf16.mxu1 %v3236_v40 }
  0xeb   : > { %2167 = vmatpush1.bf16.msra.mxu0 %v3240_v43 }
  0xec   : > { %2185 = vmatprep.subr.bf16.mxu0 %v3203_v14 }
  0xed   : > { %2183 = vmatpush1.bf16.msra.mxu1 %v3240_v43 }
  0xee   : > { %2043 = vmatmul.mubr.msk.f32.vlgmr.msra.gmra.mrb[2].mxu0 %vm656_vm3, %v653_v44  ;;  %2201 = vmatprep.subr.bf16.mxu1 %v3203_v14 }
  0xef   : > { %2187 = vmatpush1.bf16.msra.mxu0 %v3209_v23  ;;  %1017 = vmatprep.mubr.f32.mxu0 %v2838_v33 }
  0xf0   : > { %2189 = vmatprep.subr.bf16.mxu0 %v3212_v24 }
  0xf3   : > { %2191 = vmatpush1.bf16.msra.mxu0 %v3220_v32 }
  0xf4   : > { %2193 = vmatprep.subr.bf16.mxu0 %v3224_v34 }
  0xf7   : > { %2195 = vmatpush1.bf16.msra.mxu0 %v3232_v39 }
  0xf8   : > { %2197 = vmatprep.subr.bf16.mxu0 %v3236_v40 }
  0xfb   : > { %2199 = vmatpush1.bf16.msra.mxu0 %v3240_v43 }
  0xfc   : > { %2217 = vmatprep.subr.bf16.mxu0 %v3203_v14 }
 0x1b1   : > { %v2105_v46 = vpop.f32.mrb[0].mxu0 }
 0x1b2   : > { %v542_v47 = vadd.f32 %v2105_v46, %v2037_v45  ;;  %v536_v48 = vpop.f32.mrb[1].mxu0 }
 0x1b3   : > { %v537_v50 = vadd.f32 %v2037_v45, %v536_v48  ;;  %v2116_v51 = vpop.f32.mrb[0].mxu1 }
 0x1b4   : > { %v733_v52 = vrot.slane %v542_v47, 7  ;;  %v1025_v53 = vrot.slane %v542_v47, 1  ;;  %v1166_v54 = vrot.slane %v542_v47, 2  ;;  %v1307_v55 = vrot.slane %v542_v47, 3  ;;  %v628_v57 = vpop.f32.mrb[1].mxu1 }
 0x1b5   : > { %v634_v56 = vadd.f32 %v2116_v51, %v2040_v49  ;;  %v884_v58 = vrot.slane %v537_v50, 1  ;;  %v1024_v59 = vrot.slane %v537_v50, 2  ;;  %v1165_v60 = vrot.slane %v537_v50, 3 }
 0x1b6   : > { %v629_v61 = vadd.f32 %v2040_v49, %v628_v57  ;;  %v735_v62 = vsel %vm734_vm4, %v733_v52, %v537_v50  ;;  %v1306_v63 = vrot.slane %v537_v50, 4  ;;  %v1447_v0 = vrot.slane %v537_v50, 5 }
 0x1b7   : > { %v741_v1 = vrot.slane %v634_v56, 6  ;;  %v3268_v2 = vsel %vm734_vm4, %v542_v47, %v884_v58  ;;  %v889_v3 = vrot.slane %v634_v56, 5  ;;  %v3271_v4 = vsel %vm734_vm4, %v1025_v53, %v1024_v59 }
 0x1b8   : > { %v740_v5 = vrot.slane %v629_v61, 7  ;;  %v888_v6 = vrot.slane %v629_v61, 6  ;;  %v1029_v7 = vrot.slane %v629_v61, 5  ;;  %v1030_v8 = vrot.slane %v634_v56, 4 }
 0x1b9   : > { %v3274_v9 = vsel %vm734_vm4, %v1166_v54, %v1165_v60  ;;  %v1170_v10 = vrot.slane %v629_v61, 4  ;;  %v1171_v11 = vrot.slane %v634_v56, 3  ;;  %v3277_v12 = vsel %vm734_vm4, %v1307_v55, %v1306_v63 }
 0x1ba   : > { %v742_v13 = vsel %vm734_vm4, %v741_v1, %v740_v5  ;;  %v3281_v15 = vsel %vm734_vm4, %v889_v3, %v888_v6  ;;  %v3284_v16 = vsel %vm734_vm4, %v1030_v8, %v1029_v7  ;;  %v1311_v17 = vrot.slane %v629_v61, 3 }
 0x1bb   : > { %v3287_v18 = vsel %vm734_vm4, %v1171_v11, %v1170_v10  ;;  %v1312_v19 = vrot.slane %v634_v56, 2  ;;  %v1448_v20 = vrot.slane %v542_v47, 4  ;;  %v1452_v21 = vrot.slane %v629_v61, 2 }
 0x1bc   : > { %v1453_v22 = vrot.slane %v634_v56, 1  ;;  %v1588_v25 = vrot.slane %v537_v50, 6  ;;  %v1589_v26 = vrot.slane %v542_v47, 5  ;;  %v1593_v27 = vrot.slane %v629_v61, 1 }
 0x1bd   : > { %v3290_v28 = vsel %vm734_vm4, %v1312_v19, %v1311_v17  ;;  %v3293_v29 = vsel %vm734_vm4, %v1448_v20, %v1447_v0  ;;  %v1728_v30 = vrot.slane %v537_v50, 7  ;;  %v1729_v31 = vrot.slane %v542_v47, 6 }
 0x1be   : > { %v3296_v35 = vsel %vm734_vm4, %v1453_v22, %v1452_v21  ;;  %v3299_v36 = vsel %vm734_vm4, %v1589_v26, %v1588_v25  ;;  %v3302_v37 = vsel %vm734_vm4, %v634_v56, %v1593_v27  ;;  %v1733_v38 = vrot.slane %v634_v56, 7 }
 0x1bf   : > { %v3305_v41 = vsel %vm734_vm4, %v1729_v31, %v1728_v30 }
 0x1c0   : > { %v3308_v42 = vsel %vm734_vm4, %v1733_v38, %v629_v61 }
 0x1c1   : > { %v726_v44 = vpop.f32.mrb[2].mxu0 }
 0x1c2   : > { %v737_v45 = vadd.f32 %v735_v62, %v726_v44  ;;  %v728_v46 = vpop.f32.mrb[3].mxu0  ;;  %v754_v62 = vpop.permute.xlu1 %753 }
 0x1c3   : > { %v744_v47 = vadd.f32 %v742_v13, %v728_v46 }
 0x1c4   : > { %2420 = vtanh.f32 %v737_v45  ;;  %v2044_v50 = vmul.f32 -1.442695, %v737_v45 }
 0x1c5   : > { %2422 = vtanh.f32 %v744_v47  ;;  %v2045_v51 = vmul.f32 -1.442695, %v744_v47 }
 0x1c6   : > { %2424 = vpow2.f32 %v2044_v50  ;;  %v782_v0 = vpop.permute.xlu1 %781 }
 0x1c7   : > { %2426 = vpow2.f32 %v2045_v51 }
 0x1ce   : > { %v2421_v48 = vpop.eup %2420 }
 0x1cf   : > { %758 = vrot.lane.b32.xlu0 %v2421_v48, %s2839_s15  ;;  %v2423_v49 = vpop.eup %2422 }
 0x1d0   : > { %v2425_v52 = vpop.eup %2424 }
 0x1d1   : > { %v748_v53 = vadd.f32 1.0, %v2425_v52  ;;  %v2427_v54 = vpop.eup %2426 }
 0x1d2   : > { %v776_v55 = vadd.f32 1.0, %v2427_v54 }
 0x1d3   : > { %786 = vrot.lane.b32.xlu0 %v2423_v49, %s2839_s15  ;;  %2428 = vrcp.f32 %v748_v53 }
 0x1d4   : > { %2430 = vrcp.f32 %v776_v55 }
 0x1dd   : > { %v2429_v56 = vpop.eup %2428 }
 0x1de   : > { %v2431_v59 = vpop.eup %2430  ;;  %v756_v63 = vmul.f32 %v2429_v56, %v754_v62 }
 0x1df   : > { %v784_v5 = vmul.f32 %v2431_v59, %v782_v0 }
 0x241   : > { %v759_v57 = vpop.permute.xlu0 %758 }
 0x242   : > { %v761_v58 = vmul.f32 %v2429_v56, %v759_v57 }
 0x244   : > { %763 = vrot.lane.b32.xlu0 %v761_v58, %s2837_s17 }
 0x245   : > { %v787_v60 = vpop.permute.xlu0 %786 }
 0x246   : > { %v789_v61 = vmul.f32 %v2431_v59, %v787_v60 }
 0x248   : > { %791 = vrot.lane.b32.xlu1 %v789_v61, %s2837_s17 }
 0x2b6   : > { %v764_v1 = vpop.permute.xlu0 %763 }
 0x2b7   : > { %v766_v3 = vadd.f32 %v764_v1, %v756_v63 }
 0x2b9   : > { %2432 = vtanh.f32 %v766_v3 }
 0x2ba   : > { %v792_v6 = vpop.permute.xlu1 %791 }
 0x2bb   : > { %v794_v7 = vadd.f32 %v792_v6, %v784_v5 }
 0x2bd   : > { %2434 = vtanh.f32 %v794_v7 }
 0x2c3   : > { %v2433_v8 = vpop.eup %2432 }
 0x2c4   : > { %769 = vrot.lane.b32.xlu0 %v2433_v8, %s2839_s15 }
 0x2c7   : > { %v2435_v10 = vpop.eup %2434 }
 0x2c8   : > { %797 = vrot.lane.b32.xlu1 %v2435_v10, %s2839_s15 }
 0x336   : > { %v770_v11 = vpop.permute.xlu0 %769 }
 0x337   : > { %v772_v13 = vmul.f32 %v2429_v56, %v770_v11 }
 0x339   : > { %802 = vrot.lane.b32.xlu0 %v772_v13, %s2837_s17 }
 0x33a   : > { %v798_v17 = vpop.permute.xlu1 %797 }
 0x33b   : > { %v800_v19 = vmul.f32 %v2431_v59, %v798_v17 }
 0x33d   : > { %806 = vrot.lane.b32.xlu1 %v800_v19, %s2839_s15 }
 0x3ab   : > { %v803_v20 = vpop.permute.xlu0 %802 }
 0x3af   : > { %v807_v21 = vpop.permute.xlu1 %806 }
 0x3b0   : > { %v809_v22 = vsel %vm463_vm2, %v803_v20, %v807_v21 }
 0x3b1   : > { %2046 = vmatmul.mubr.msk.f32.vlgmr.msra.gmra.mrb[2].mxu1 %vm656_vm3, %v809_v22 }
 0x3b2   : > { %2203 = vmatpush1.bf16.msra.mxu1 %v3209_v23  ;;  %1158 = vmatprep.mubr.f32.mxu1 %v2838_v33 }
 0x3b3   : > { %2205 = vmatprep.subr.bf16.mxu1 %v3212_v24 }
 0x3b6   : > { %2207 = vmatpush1.bf16.msra.mxu1 %v3220_v32 }
 0x3b7   : > { %2209 = vmatprep.subr.bf16.mxu1 %v3224_v34 }
 0x3ba   : > { %2211 = vmatpush1.bf16.msra.mxu1 %v3232_v39 }
 0x3bb   : > { %2213 = vmatprep.subr.bf16.mxu1 %v3236_v40 }
 0x3be   : > { %2215 = vmatpush1.bf16.msra.mxu1 %v3240_v43 }
 0x3bf   : > { %2233 = vmatprep.subr.bf16.mxu1 %v3203_v14 }
 0x484   : > { %v879_v25 = vpop.f32.mrb[2].mxu1 }
 0x485   : > { %v887_v26 = vadd.f32 %v3268_v2, %v879_v25  ;;  %v881_v27 = vpop.f32.mrb[3].mxu1 }
 0x486   : > { %v892_v30 = vadd.f32 %v3281_v15, %v881_v27 }
 0x487   : > { %2436 = vtanh.f32 %v887_v26  ;;  %v2047_v44 = vmul.f32 -1.442695, %v887_v26 }
 0x488   : > { %2438 = vtanh.f32 %v892_v30  ;;  %v2048_v45 = vmul.f32 -1.442695, %v892_v30 }
 0x489   : > { %2440 = vpow2.f32 %v2047_v44 }
 0x48a   : > { %2442 = vpow2.f32 %v2048_v45 }
 0x491   : > { %v2437_v31 = vpop.eup %2436 }
 0x492   : > { %v2439_v38 = vpop.eup %2438  ;;  %902 = vrot.lane.b32.xlu0 %v2437_v31, %s2839_s15 }
 0x493   : > { %926 = vrot.lane.b32.xlu1 %v2439_v38, %s2839_s15  ;;  %v2441_v46 = vpop.eup %2440 }
 0x494   : > { %v2443_v47 = vpop.eup %2442  ;;  %v896_v48 = vadd.f32 1.0, %v2441_v46 }
 0x495   : > { %v920_v49 = vadd.f32 1.0, %v2443_v47 }
 0x496   : > { %2444 = vrcp.f32 %v896_v48 }
 0x497   : > { %2446 = vrcp.f32 %v920_v49 }
 0x4a0   : > { %v2445_v2 = vpop.eup %2444 }
 0x4a1   : > { %v2447_v50 = vpop.eup %2446  ;;  %v900_v54 = vmul.f32 %v2445_v2, %v766_v3 }
 0x4a2   : > { %v924_v56 = vmul.f32 %v2447_v50, %v794_v7 }
 0x504   : > { %v903_v15 = vpop.permute.xlu0 %902 }
 0x505   : > { %v905_v51 = vmul.f32 %v2445_v2, %v903_v15  ;;  %v927_v52 = vpop.permute.xlu1 %926 }
 0x506   : > { %v929_v53 = vmul.f32 %v2447_v50, %v927_v52 }
 0x507   : > { %907 = vrot.lane.b32.xlu0 %v905_v51, %s2837_s17 }
 0x508   : > { %931 = vrot.lane.b32.xlu1 %v929_v53, %s2837_s17 }
 0x579   : > { %v908_v55 = vpop.permute.xlu0 %907 }
 0x57a   : > { %v910_v57 = vadd.f32 %v908_v55, %v900_v54  ;;  %v932_v58 = vpop.permute.xlu1 %931 }
 0x57b   : > { %v934_v59 = vadd.f32 %v932_v58, %v924_v56 }
 0x57c   : > { %2448 = vtanh.f32 %v910_v57 }
 0x57d   : > { %2450 = vtanh.f32 %v934_v59 }
 0x586   : > { %v2449_v60 = vpop.eup %2448 }
 0x587   : > { %v2451_v61 = vpop.eup %2450  ;;  %913 = vrot.lane.b32.xlu0 %v2449_v60, %s2839_s15 }
 0x588   : > { %937 = vrot.lane.b32.xlu1 %v2451_v61, %s2839_s15 }
 0x5f9   : > { %v914_v62 = vpop.permute.xlu0 %913 }
 0x5fa   : > { %v916_v63 = vmul.f32 %v2445_v2, %v914_v62  ;;  %v938_v0 = vpop.permute.xlu1 %937 }
 0x5fb   : > { %v940_v1 = vmul.f32 %v2447_v50, %v938_v0 }
 0x5fc   : > { %942 = vrot.lane.b32.xlu0 %v916_v63, %s2837_s17 }
 0x5fd   : > { %946 = vrot.lane.b32.xlu1 %v940_v1, %s2839_s15 }
 0x66e   : > { %v943_v3 = vpop.permute.xlu0 %942 }
 0x66f   : > { %v947_v5 = vpop.permute.xlu1 %946 }
 0x670   : > { %v949_v6 = vsel %vm463_vm2, %v943_v3, %v947_v5 }
 0x671   : > { %2049 = vmatmul.mubr.msk.f32.vlgmr.msra.gmra.mrb[4].mxu0 %vm656_vm3, %v949_v6 }
 0x672   : > { %2219 = vmatpush1.bf16.msra.mxu0 %v3209_v23  ;;  %1299 = vmatprep.mubr.f32.mxu0 %v2838_v33 }
 0x673   : > { %2221 = vmatprep.subr.bf16.mxu0 %v3212_v24 }
 0x676   : > { %2223 = vmatpush1.bf16.msra.mxu0 %v3220_v32 }
 0x677   : > { %2225 = vmatprep.subr.bf16.mxu0 %v3224_v34 }
 0x67a   : > { %2227 = vmatpush1.bf16.msra.mxu0 %v3232_v39 }
 0x67b   : > { %2229 = vmatprep.subr.bf16.mxu0 %v3236_v40 }
 0x67e   : > { %2231 = vmatpush1.bf16.msra.mxu0 %v3240_v43 }
 0x67f   : > { %2249 = vmatprep.subr.bf16.mxu0 %v3203_v14 }
 0x744   : > { %v1019_v7 = vpop.f32.mrb[4].mxu0 }
 0x745   : > { %v1028_v8 = vadd.f32 %v3271_v4, %v1019_v7  ;;  %v1021_v10 = vpop.f32.mrb[5].mxu0 }
 0x746   : > { %v1033_v11 = vadd.f32 %v3284_v16, %v1021_v10 }
 0x747   : > { %2452 = vtanh.f32 %v1028_v8  ;;  %v2050_v19 = vmul.f32 -1.442695, %v1028_v8 }
 0x748   : > { %2454 = vtanh.f32 %v1033_v11  ;;  %v2051_v20 = vmul.f32 -1.442695, %v1033_v11 }
 0x749   : > { %2456 = vpow2.f32 %v2050_v19 }
 0x74a   : > { %2458 = vpow2.f32 %v2051_v20 }
 0x751   : > { %v2453_v13 = vpop.eup %2452 }
 0x752   : > { %v2455_v17 = vpop.eup %2454  ;;  %1043 = vrot.lane.b32.xlu0 %v2453_v13, %s2839_s15 }
 0x753   : > { %1067 = vrot.lane.b32.xlu1 %v2455_v17, %s2839_s15  ;;  %v2457_v21 = vpop.eup %2456 }
 0x754   : > { %v2459_v22 = vpop.eup %2458  ;;  %v1037_v25 = vadd.f32 1.0, %v2457_v21 }
 0x755   : > { %v1061_v26 = vadd.f32 1.0, %v2459_v22 }
 0x756   : > { %2460 = vrcp.f32 %v1037_v25 }
 0x757   : > { %2462 = vrcp.f32 %v1061_v26 }
 0x760   : > { %v2461_v4 = vpop.eup %2460 }
 0x761   : > { %v2463_v27 = vpop.eup %2462  ;;  %v1041_v44 = vmul.f32 %v2461_v4, %v910_v57 }
 0x762   : > { %v1065_v46 = vmul.f32 %v2463_v27, %v934_v59 }
 0x7c4   : > { %v1044_v16 = vpop.permute.xlu0 %1043 }
 0x7c5   : > { %v1046_v30 = vmul.f32 %v2461_v4, %v1044_v16  ;;  %v1068_v31 = vpop.permute.xlu1 %1067 }
 0x7c6   : > { %v1070_v38 = vmul.f32 %v2463_v27, %v1068_v31 }
 0x7c7   : > { %1048 = vrot.lane.b32.xlu0 %v1046_v30, %s2837_s17 }
 0x7c8   : > { %1072 = vrot.lane.b32.xlu1 %v1070_v38, %s2837_s17 }
 0x839   : > { %v1049_v45 = vpop.permute.xlu0 %1048 }
 0x83a   : > { %v1051_v47 = vadd.f32 %v1049_v45, %v1041_v44  ;;  %v1073_v48 = vpop.permute.xlu1 %1072 }
 0x83b   : > { %v1075_v49 = vadd.f32 %v1073_v48, %v1065_v46 }
 0x83c   : > { %2464 = vtanh.f32 %v1051_v47 }
 0x83d   : > { %2466 = vtanh.f32 %v1075_v49 }
 0x846   : > { %v2465_v2 = vpop.eup %2464 }
 0x847   : > { %v2467_v15 = vpop.eup %2466  ;;  %1054 = vrot.lane.b32.xlu0 %v2465_v2, %s2839_s15 }
 0x848   : > { %1078 = vrot.lane.b32.xlu1 %v2467_v15, %s2839_s15 }
 0x8b9   : > { %v1055_v50 = vpop.permute.xlu0 %1054 }
 0x8ba   : > { %v1057_v51 = vmul.f32 %v2461_v4, %v1055_v50  ;;  %v1079_v52 = vpop.permute.xlu1 %1078 }
 0x8bb   : > { %v1081_v53 = vmul.f32 %v2463_v27, %v1079_v52 }
 0x8bc   : > { %1083 = vrot.lane.b32.xlu0 %v1057_v51, %s2837_s17 }
 0x8bd   : > { %1087 = vrot.lane.b32.xlu1 %v1081_v53, %s2839_s15 }
 0x92e   : > { %v1084_v54 = vpop.permute.xlu0 %1083 }
 0x92f   : > { %v1088_v55 = vpop.permute.xlu1 %1087 }
 0x930   : > { %v1090_v56 = vsel %vm463_vm2, %v1084_v54, %v1088_v55 }
 0x931   : > { %2052 = vmatmul.mubr.msk.f32.vlgmr.msra.gmra.mrb[4].mxu1 %vm656_vm3, %v1090_v56 }
 0x932   : > { %2235 = vmatpush1.bf16.msra.mxu1 %v3209_v23  ;;  %1440 = vmatprep.mubr.f32.mxu1 %v2838_v33 }
 0x933   : > { %2237 = vmatprep.subr.bf16.mxu1 %v3212_v24 }
 0x936   : > { %2239 = vmatpush1.bf16.msra.mxu1 %v3220_v32 }
 0x937   : > { %2241 = vmatprep.subr.bf16.mxu1 %v3224_v34 }
 0x93a   : > { %2243 = vmatpush1.bf16.msra.mxu1 %v3232_v39 }
 0x93b   : > { %2245 = vmatprep.subr.bf16.mxu1 %v3236_v40 }
 0x93e   : > { %2247 = vmatpush1.bf16.msra.mxu1 %v3240_v43 }
 0x93f   : > { %2265 = vmatprep.subr.bf16.mxu1 %v3203_v14 }
 0xa04   : > { %v1160_v57 = vpop.f32.mrb[4].mxu1 }
 0xa05   : > { %v1169_v58 = vadd.f32 %v3274_v9, %v1160_v57  ;;  %v1162_v59 = vpop.f32.mrb[5].mxu1 }
 0xa06   : > { %v1174_v60 = vadd.f32 %v3287_v18, %v1162_v59 }
 0xa07   : > { %2468 = vtanh.f32 %v1169_v58  ;;  %v2053_v63 = vmul.f32 -1.442695, %v1169_v58 }
 0xa08   : > { %2470 = vtanh.f32 %v1174_v60  ;;  %v2054_v0 = vmul.f32 -1.442695, %v1174_v60 }
 0xa09   : > { %2472 = vpow2.f32 %v2053_v63 }
 0xa0a   : > { %2474 = vpow2.f32 %v2054_v0 }
 0xa11   : > { %v2469_v61 = vpop.eup %2468 }
 0xa12   : > { %v2471_v62 = vpop.eup %2470  ;;  %1184 = vrot.lane.b32.xlu0 %v2469_v61, %s2839_s15 }
 0xa13   : > { %1208 = vrot.lane.b32.xlu1 %v2471_v62, %s2839_s15  ;;  %v2473_v1 = vpop.eup %2472 }
 0xa14   : > { %v2475_v14 = vpop.eup %2474  ;;  %v1178_v3 = vadd.f32 1.0, %v2473_v1 }
 0xa15   : > { %v1202_v5 = vadd.f32 1.0, %v2475_v14 }
 0xa16   : > { %2476 = vrcp.f32 %v1178_v3 }
 0xa17   : > { %2478 = vrcp.f32 %v1202_v5 }
 0xa20   : > { %v2477_v9 = vpop.eup %2476 }
 0xa21   : > { %v2479_v6 = vpop.eup %2478  ;;  %v1182_v11 = vmul.f32 %v2477_v9, %v1051_v47 }
 0xa22   : > { %v1206_v17 = vmul.f32 %v2479_v6, %v1075_v49 }
 0xa84   : > { %v1185_v18 = vpop.permute.xlu0 %1184 }
 0xa85   : > { %v1187_v7 = vmul.f32 %v2477_v9, %v1185_v18  ;;  %v1209_v8 = vpop.permute.xlu1 %1208 }
 0xa86   : > { %v1211_v10 = vmul.f32 %v2479_v6, %v1209_v8 }
 0xa87   : > { %1189 = vrot.lane.b32.xlu0 %v1187_v7, %s2837_s17 }
 0xa88   : > { %1213 = vrot.lane.b32.xlu1 %v1211_v10, %s2837_s17 }
 0xaf9   : > { %v1190_v13 = vpop.permute.xlu0 %1189 }
 0xafa   : > { %v1192_v19 = vadd.f32 %v1190_v13, %v1182_v11  ;;  %v1214_v20 = vpop.permute.xlu1 %1213 }
 0xafb   : > { %v1216_v21 = vadd.f32 %v1214_v20, %v1206_v17 }
 0xafc   : > { %2480 = vtanh.f32 %v1192_v19 }
 0xafd   : > { %2482 = vtanh.f32 %v1216_v21 }
 0xb06   : > { %v2481_v22 = vpop.eup %2480 }
 0xb07   : > { %v2483_v25 = vpop.eup %2482  ;;  %1195 = vrot.lane.b32.xlu0 %v2481_v22, %s2839_s15 }
 0xb08   : > { %1219 = vrot.lane.b32.xlu1 %v2483_v25, %s2839_s15 }
 0xb79   : > { %v1196_v26 = vpop.permute.xlu0 %1195 }
 0xb7a   : > { %v1198_v4 = vmul.f32 %v2477_v9, %v1196_v26  ;;  %v1220_v16 = vpop.permute.xlu1 %1219 }
 0xb7b   : > { %v1222_v27 = vmul.f32 %v2479_v6, %v1220_v16 }
 0xb7c   : > { %1224 = vrot.lane.b32.xlu0 %v1198_v4, %s2837_s17 }
 0xb7d   : > { %1228 = vrot.lane.b32.xlu1 %v1222_v27, %s2839_s15 }
 0xbee   : > { %v1225_v30 = vpop.permute.xlu0 %1224 }
 0xbef   : > { %v1229_v31 = vpop.permute.xlu1 %1228 }
 0xbf0   : > { %v1231_v38 = vsel %vm463_vm2, %v1225_v30, %v1229_v31 }
 0xbf1   : > { %2055 = vmatmul.mubr.msk.f32.vlgmr.msra.gmra.mrb[6].mxu0 %vm656_vm3, %v1231_v38 }
 0xbf2   : > { %2251 = vmatpush1.bf16.msra.mxu0 %v3209_v23  ;;  %1581 = vmatprep.mubr.f32.mxu0 %v2838_v33 }
 0xbf3   : > { %2253 = vmatprep.subr.bf16.mxu0 %v3212_v24 }
 0xbf6   : > { %2255 = vmatpush1.bf16.msra.mxu0 %v3220_v32 }
 0xbf7   : > { %2257 = vmatprep.subr.bf16.mxu0 %v3224_v34 }
 0xbfa   : > { %2259 = vmatpush1.bf16.msra.mxu0 %v3232_v39 }
 0xbfb   : > { %2261 = vmatprep.subr.bf16.mxu0 %v3236_v40 }
 0xbfe   : > { %2263 = vmatpush1.bf16.msra.mxu0 %v3240_v43 }
 0xcc4   : > { %v1301_v44 = vpop.f32.mrb[6].mxu0 }
 0xcc5   : > { %v1310_v45 = vadd.f32 %v3277_v12, %v1301_v44  ;;  %v1303_v46 = vpop.f32.mrb[7].mxu0 }
 0xcc6   : > { %v1315_v47 = vadd.f32 %v3290_v28, %v1303_v46 }
 0xcc7   : > { %2484 = vtanh.f32 %v1310_v45  ;;  %v2056_v2 = vmul.f32 -1.442695, %v1310_v45 }
 0xcc8   : > { %2486 = vtanh.f32 %v1315_v47  ;;  %v2057_v15 = vmul.f32 -1.442695, %v1315_v47 }
 0xcc9   : > { %2488 = vpow2.f32 %v2056_v2 }
 0xcca   : > { %2490 = vpow2.f32 %v2057_v15 }
 0xcd1   : > { %v2485_v48 = vpop.eup %2484 }
 0xcd2   : > { %v2487_v49 = vpop.eup %2486  ;;  %1325 = vrot.lane.b32.xlu0 %v2485_v48, %s2839_s15 }
 0xcd3   : > { %1349 = vrot.lane.b32.xlu1 %v2487_v49, %s2839_s15  ;;  %v2489_v50 = vpop.eup %2488 }
 0xcd4   : > { %v2491_v51 = vpop.eup %2490  ;;  %v1319_v52 = vadd.f32 1.0, %v2489_v50 }
 0xcd5   : > { %v1343_v53 = vadd.f32 1.0, %v2491_v51 }
 0xcd6   : > { %2492 = vrcp.f32 %v1319_v52 }
 0xcd7   : > { %2494 = vrcp.f32 %v1343_v53 }
 0xce0   : > { %v2493_v12 = vpop.eup %2492 }
 0xce1   : > { %v2495_v54 = vpop.eup %2494  ;;  %v1323_v58 = vmul.f32 %v2493_v12, %v1192_v19 }
 0xce2   : > { %v1347_v60 = vmul.f32 %v2495_v54, %v1216_v21 }
 0xd44   : > { %v1326_v28 = vpop.permute.xlu0 %1325 }
 0xd45   : > { %v1328_v55 = vmul.f32 %v2493_v12, %v1326_v28  ;;  %v1350_v56 = vpop.permute.xlu1 %1349 }
 0xd46   : > { %v1352_v57 = vmul.f32 %v2495_v54, %v1350_v56 }
 0xd47   : > { %1330 = vrot.lane.b32.xlu0 %v1328_v55, %s2837_s17 }
 0xd48   : > { %1354 = vrot.lane.b32.xlu1 %v1352_v57, %s2837_s17 }
 0xdb9   : > { %v1331_v59 = vpop.permute.xlu0 %1330 }
 0xdba   : > { %v1333_v61 = vadd.f32 %v1331_v59, %v1323_v58  ;;  %v1355_v62 = vpop.permute.xlu1 %1354 }
 0xdbb   : > { %v1357_v63 = vadd.f32 %v1355_v62, %v1347_v60 }
 0xdbc   : > { %2496 = vtanh.f32 %v1333_v61 }
 0xdbd   : > { %2498 = vtanh.f32 %v1357_v63 }
 0xdc6   : > { %v2497_v0 = vpop.eup %2496 }
 0xdc7   : > { %v2499_v1 = vpop.eup %2498  ;;  %1336 = vrot.lane.b32.xlu0 %v2497_v0, %s2839_s15 }
 0xdc8   : > { %1360 = vrot.lane.b32.xlu1 %v2499_v1, %s2839_s15 }
 0xe39   : > { %v1337_v14 = vpop.permute.xlu0 %1336 }
 0xe3a   : > { %v1339_v3 = vmul.f32 %v2493_v12, %v1337_v14  ;;  %v1361_v5 = vpop.permute.xlu1 %1360 }
 0xe3b   : > { %v1363_v9 = vmul.f32 %v2495_v54, %v1361_v5 }
 0xe3c   : > { %1365 = vrot.lane.b32.xlu0 %v1339_v3, %s2837_s17 }
 0xe3d   : > { %1369 = vrot.lane.b32.xlu1 %v1363_v9, %s2839_s15 }
 0xeae   : > { %v1366_v18 = vpop.permute.xlu0 %1365 }
 0xeaf   : > { %v1370_v6 = vpop.permute.xlu1 %1369 }
 0xeb0   : > { %v1372_v7 = vsel %vm463_vm2, %v1366_v18, %v1370_v6 }
 0xeb1   : > { %2058 = vmatmul.mubr.msk.f32.vlgmr.msra.gmra.mrb[6].mxu1 %vm656_vm3, %v1372_v7 }
 0xeb2   : > { %2267 = vmatpush1.bf16.msra.mxu1 %v3209_v23  ;;  %1721 = vmatprep.mubr.f32.mxu1 %v2838_v33 }
 0xeb3   : > { %2269 = vmatprep.subr.bf16.mxu1 %v3212_v24 }
 0xeb6   : > { %2271 = vmatpush1.bf16.msra.mxu1 %v3220_v32 }
 0xeb7   : > { %2273 = vmatprep.subr.bf16.mxu1 %v3224_v34 }
 0xeba   : > { %2275 = vmatpush1.bf16.msra.mxu1 %v3232_v39 }
 0xebb   : > { %2277 = vmatprep.subr.bf16.mxu1 %v3236_v40 }
 0xebe   : > { %2279 = vmatpush1.bf16.msra.mxu1 %v3240_v43 }
 0xf84   : > { %v1442_v8 = vpop.f32.mrb[6].mxu1 }
 0xf85   : > { %v1451_v10 = vadd.f32 %v3293_v29, %v1442_v8  ;;  %v1444_v11 = vpop.f32.mrb[7].mxu1 }
 0xf86   : > { %v1456_v23 = vadd.f32 %v3296_v35, %v1444_v11 }
 0xf87   : > { %2500 = vtanh.f32 %v1451_v10  ;;  %v2059_v32 = vmul.f32 -1.442695, %v1451_v10 }
 0xf88   : > { %2502 = vtanh.f32 %v1456_v23  ;;  %v2060_v34 = vmul.f32 -1.442695, %v1456_v23 }
 0xf89   : > { %2504 = vpow2.f32 %v2059_v32 }
 0xf8a   : > { %2506 = vpow2.f32 %v2060_v34 }
 0xf91   : > { %v2501_v33 = vpop.eup %2500 }
 0xf92   : > { %v2503_v24 = vpop.eup %2502  ;;  %1466 = vrot.lane.b32.xlu0 %v2501_v33, %s2839_s15 }
 0xf93   : > { %1490 = vrot.lane.b32.xlu1 %v2503_v24, %s2839_s15  ;;  %v2505_v39 = vpop.eup %2504 }
 0xf94   : > { %v2507_v40 = vpop.eup %2506  ;;  %v1460_v43 = vadd.f32 1.0, %v2505_v39 }
 0xf95   : > { %v1484_v13 = vadd.f32 1.0, %v2507_v40 }
 0xf96   : > { %2508 = vrcp.f32 %v1460_v43 }
 0xf97   : > { %2510 = vrcp.f32 %v1484_v13 }
 0xfa0   : > { %v2509_v29 = vpop.eup %2508 }
 0xfa1   : > { %v2511_v17 = vpop.eup %2510  ;;  %v1464_v22 = vmul.f32 %v2509_v29, %v1333_v61 }
 0xfa2   : > { %v1488_v26 = vmul.f32 %v2511_v17, %v1357_v63 }
0x1004   : > { %v1467_v35 = vpop.permute.xlu0 %1466 }
0x1005   : > { %v1469_v19 = vmul.f32 %v2509_v29, %v1467_v35  ;;  %v1491_v20 = vpop.permute.xlu1 %1490 }
0x1006   : > { %v1493_v21 = vmul.f32 %v2511_v17, %v1491_v20 }
0x1007   : > { %1471 = vrot.lane.b32.xlu0 %v1469_v19, %s2837_s17 }
0x1008   : > { %1495 = vrot.lane.b32.xlu1 %v1493_v21, %s2837_s17 }
0x1079   : > { %v1472_v25 = vpop.permute.xlu0 %1471 }
0x107a   : > { %v1474_v4 = vadd.f32 %v1472_v25, %v1464_v22  ;;  %v1496_v16 = vpop.permute.xlu1 %1495 }
0x107b   : > { %v1498_v27 = vadd.f32 %v1496_v16, %v1488_v26 }
0x107c   : > { %2512 = vtanh.f32 %v1474_v4 }
0x107d   : > { %2514 = vtanh.f32 %v1498_v27 }
0x1086   : > { %v2513_v30 = vpop.eup %2512 }
0x1087   : > { %v2515_v31 = vpop.eup %2514  ;;  %1477 = vrot.lane.b32.xlu0 %v2513_v30, %s2839_s15 }
0x1088   : > { %1501 = vrot.lane.b32.xlu1 %v2515_v31, %s2839_s15 }
0x10f9   : > { %v1478_v38 = vpop.permute.xlu0 %1477 }
0x10fa   : > { %v1480_v44 = vmul.f32 %v2509_v29, %v1478_v38  ;;  %v1502_v45 = vpop.permute.xlu1 %1501 }
0x10fb   : > { %v1504_v46 = vmul.f32 %v2511_v17, %v1502_v45 }
0x10fc   : > { %1506 = vrot.lane.b32.xlu0 %v1480_v44, %s2837_s17 }
0x10fd   : > { %1510 = vrot.lane.b32.xlu1 %v1504_v46, %s2839_s15 }
0x116e   : > { %v1507_v47 = vpop.permute.xlu0 %1506 }
0x116f   : > { %v1511_v48 = vpop.permute.xlu1 %1510 }
0x1170   : > { %v1513_v49 = vsel %vm463_vm2, %v1507_v47, %v1511_v48 }
0x1171   : > { %2061 = vmatmul.mubr.msk.f32.vlgmr.msra.gmra.mrb[8].mxu0 %vm656_vm3, %v1513_v49 }
0x1244   : > { %v1583_v2 = vpop.f32.mrb[8].mxu0 }
0x1245   : > { %v1592_v15 = vadd.f32 %v3299_v36, %v1583_v2  ;;  %v1585_v50 = vpop.f32.mrb[9].mxu0 }
0x1246   : > { %v1596_v51 = vadd.f32 %v3302_v37, %v1585_v50 }
0x1247   : > { %2516 = vtanh.f32 %v1592_v15  ;;  %v2062_v12 = vmul.f32 -1.442695, %v1592_v15 }
0x1248   : > { %2518 = vtanh.f32 %v1596_v51  ;;  %v2063_v28 = vmul.f32 -1.442695, %v1596_v51 }
0x1249   : > { %2520 = vpow2.f32 %v2062_v12  ;;  %v1813_v12 = vld [vmem:[#allocation14 + $0x10] sm:$0xff] (!%p2067_p1) }
0x124a   : > { %2522 = vpow2.f32 %v2063_v28  ;;  %v2841_v28 = vmov (!%p2067_p1), 0.0|0.0  }
0x124b   : > { %2280 = vmatprep.subr.bf16.mxu0 (!%p2067_p1), %v2841_v28 }
0x1251   : > { %v2517_v52 = vpop.eup %2516 }
0x1252   : > { %v2519_v53 = vpop.eup %2518  ;;  %1606 = vrot.lane.b32.xlu0 %v2517_v52, %s2839_s15  ;;  %v1811_v52 = vld [vmem:[#allocation14] sm:$0xff] (!%p2067_p1) }
0x1253   : > { %1630 = vrot.lane.b32.xlu1 %v2519_v53, %s2839_s15  ;;  %v2521_v54 = vpop.eup %2520  ;;  %v1812_v53 = vld [vmem:[#allocation14 + $0x8] sm:$0xff] (!%p2067_p1) }
0x1254   : > { %v2523_v55 = vpop.eup %2522  ;;  %v1600_v56 = vadd.f32 1.0, %v2521_v54  ;;  %v2281_v54 = vpack.c.bf16 (!%p2067_p1), %v1812_v53, %v1811_v52 }
0x1255   : > { %v1624_v57 = vadd.f32 1.0, %v2523_v55  ;;  %v1814_v55 = vld [vmem:[#allocation14 + $0x18] sm:$0xff] (!%p2067_p1) }
0x1256   : > { %2524 = vrcp.f32 %v1600_v56  ;;  %v2843_v56 = vmov (!%p2067_p1), 0.0   ;;  %2282 = vmatpush3.bf16.msra.mxu0 (!%p2067_p1), %v2281_v54 }
0x1257   : > { %2526 = vrcp.f32 %v1624_v57  ;;  %2133 = vmatprep.mubr.msk.f32.mxu0 (!%p2067_p1), %vm2842_vm7, %v2843_v56  ;;  %v2284_v57 = vpack.c.bf16 (!%p2067_p1), %v1814_v55, %v1813_v12  ;;  %2283 = vmatprep.subr.bf16.mxu0 (!%p2067_p1), %v2841_v28 }
0x125a   : > { %2285 = vmatpush3.bf16.msra.mxu0 (!%p2067_p1), %v2284_v57 }
0x125b   : > { %2286 = vmatprep.subr.bf16.mxu0 (!%p2067_p1), %v2841_v28 }
0x1260   : > { %v2525_v36 = vpop.eup %2524 }
0x1261   : > { %v2527_v58 = vpop.eup %2526  ;;  %v1604_v62 = vmul.f32 %v2525_v36, %v1474_v4 }
0x1262   : > { %v1628_v0 = vmul.f32 %v2527_v58, %v1498_v27 }
0x12c4   : > { %v1607_v37 = vpop.permute.xlu0 %1606 }
0x12c5   : > { %v1609_v59 = vmul.f32 %v2525_v36, %v1607_v37  ;;  %v1631_v60 = vpop.permute.xlu1 %1630  ;;  %v1816_v37 = vld [vmem:[#allocation14 + $0x28] sm:$0xff] (!%p2067_p1) }
0x12c6   : > { %v1633_v61 = vmul.f32 %v2527_v58, %v1631_v60  ;;  %v1818_v60 = vld [vmem:[#allocation14 + $0x38] sm:$0xff] (!%p2067_p1) }
0x12c7   : > { %1611 = vrot.lane.b32.xlu0 %v1609_v59, %s2837_s17  ;;  %v1817_v59 = vld [vmem:[#allocation14 + $0x30] sm:$0xff] (!%p2067_p1) }
0x12c8   : > { %1635 = vrot.lane.b32.xlu1 %v1633_v61, %s2837_s17  ;;  %v2290_v61 = vpack.c.bf16 (!%p2067_p1), %v1818_v60, %v1817_v59 }
0x1339   : > { %v1612_v63 = vpop.permute.xlu0 %1611 }
0x133a   : > { %v1614_v1 = vadd.f32 %v1612_v63, %v1604_v62  ;;  %v1636_v14 = vpop.permute.xlu1 %1635  ;;  %v2068_v62 = vld [vmem:[%s3545_s18] ss:$0 sm:$0xff] (!%p2067_p1) }
0x133b   : > { %v1638_v3 = vadd.f32 %v1636_v14, %v1628_v0 }
0x133c   : > { %2528 = vtanh.f32 %v1614_v1 }
0x133d   : > { %2530 = vtanh.f32 %v1638_v3 }
0x1346   : > { %v2529_v5 = vpop.eup %2528 }
0x1347   : > { %v2531_v9 = vpop.eup %2530  ;;  %1617 = vrot.lane.b32.xlu0 %v2529_v5, %s2839_s15 }
0x1348   : > { %1641 = vrot.lane.b32.xlu1 %v2531_v9, %s2839_s15 }
0x13b9   : > { %v1618_v18 = vpop.permute.xlu0 %1617 }
0x13ba   : > { %v1620_v6 = vmul.f32 %v2525_v36, %v1618_v18  ;;  %v1642_v7 = vpop.permute.xlu1 %1641  ;;  %v1815_v36 = vld [vmem:[#allocation14 + $0x20] sm:$0xff] (!%p2067_p1) }
0x13bb   : > { %v1644_v8 = vmul.f32 %v2527_v58, %v1642_v7  ;;  %v2287_v58 = vpack.c.bf16 (!%p2067_p1), %v1816_v37, %v1815_v36 }
0x13bc   : > { %1646 = vrot.lane.b32.xlu0 %v1620_v6, %s2837_s17 }
0x13bd   : > { %1650 = vrot.lane.b32.xlu1 %v1644_v8, %s2839_s15  ;;  %2288 = vmatpush3.bf16.msra.mxu0 (!%p2067_p1), %v2287_v58 }
0x13be   : > { %2289 = vmatprep.subr.bf16.mxu0 (!%p2067_p1), %v2841_v28 }
0x13c1   : > { %2291 = vmatpush3.bf16.msra.mxu0 (!%p2067_p1), %v2290_v61 }
0x142e   : > { %v1647_v10 = vpop.permute.xlu0 %1646 }
0x142f   : > { %v1651_v11 = vpop.permute.xlu1 %1650 }
0x1430   : > { %v1653_v23 = vsel %vm463_vm2, %v1647_v10, %v1651_v11 }
0x1431   : > { %2064 = vmatmul.mubr.msk.f32.vlgmr.msra.gmra.mrb[8].mxu1 %vm656_vm3, %v1653_v23 }
0x1504   : > { %v1723_v33 = vpop.f32.mrb[8].mxu1 }
0x1505   : > { %v1732_v24 = vadd.f32 %v3305_v41, %v1723_v33  ;;  %v1725_v32 = vpop.f32.mrb[9].mxu1 }
0x1506   : > { %v1736_v34 = vadd.f32 %v3308_v42, %v1725_v32 }
0x1507   : > { %2532 = vtanh.f32 %v1732_v24  ;;  %v2065_v43 = vmul.f32 -1.442695, %v1732_v24 }
0x1508   : > { %2534 = vtanh.f32 %v1736_v34  ;;  %v2066_v13 = vmul.f32 -1.442695, %v1736_v34 }
0x1509   : > { %2536 = vpow2.f32 %v2065_v43 }
0x150a   : > { %2538 = vpow2.f32 %v2066_v13 }
0x1511   : > { %v2533_v39 = vpop.eup %2532 }
0x1512   : > { %v2535_v40 = vpop.eup %2534  ;;  %1746 = vrot.lane.b32.xlu0 %v2533_v39, %s2839_s15 }
0x1513   : > { %1770 = vrot.lane.b32.xlu1 %v2535_v40, %s2839_s15  ;;  %v2537_v29 = vpop.eup %2536 }
0x1514   : > { %v2539_v35 = vpop.eup %2538  ;;  %v1740_v17 = vadd.f32 1.0, %v2537_v29 }
0x1515   : > { %v1764_v19 = vadd.f32 1.0, %v2539_v35 }
0x1516   : > { %2540 = vrcp.f32 %v1740_v17 }
0x1517   : > { %2542 = vrcp.f32 %v1764_v19 }
0x1520   : > { %v2541_v41 = vpop.eup %2540 }
0x1521   : > { %v2543_v20 = vpop.eup %2542  ;;  %v1744_v26 = vmul.f32 %v2541_v41, %v1614_v1 }
0x1522   : > { %v1768_v16 = vmul.f32 %v2543_v20, %v1638_v3 }
0x1584   : > { %v1747_v42 = vpop.permute.xlu0 %1746 }
0x1585   : > { %v1749_v21 = vmul.f32 %v2541_v41, %v1747_v42  ;;  %v1771_v22 = vpop.permute.xlu1 %1770 }
0x1586   : > { %v1773_v25 = vmul.f32 %v2543_v20, %v1771_v22 }
0x1587   : > { %1751 = vrot.lane.b32.xlu0 %v1749_v21, %s2837_s17 }
0x1588   : > { %1775 = vrot.lane.b32.xlu1 %v1773_v25, %s2837_s17 }
0x15f9   : > { %v1752_v4 = vpop.permute.xlu0 %1751 }
0x15fa   : > { %v1754_v27 = vadd.f32 %v1752_v4, %v1744_v26  ;;  %v1776_v30 = vpop.permute.xlu1 %1775 }
0x15fb   : > { %v1778_v31 = vadd.f32 %v1776_v30, %v1768_v16 }
0x15fc   : > { %2544 = vtanh.f32 %v1754_v27 }
0x15fd   : > { %2546 = vtanh.f32 %v1778_v31 }
0x1606   : > { %v2545_v38 = vpop.eup %2544 }
0x1607   : > { %v2547_v44 = vpop.eup %2546  ;;  %1757 = vrot.lane.b32.xlu0 %v2545_v38, %s2839_s15 }
0x1608   : > { %1781 = vrot.lane.b32.xlu1 %v2547_v44, %s2839_s15 }
0x1679   : > { %v1758_v45 = vpop.permute.xlu0 %1757 }
0x167a   : > { %v1760_v46 = vmul.f32 %v2541_v41, %v1758_v45  ;;  %v1782_v47 = vpop.permute.xlu1 %1781 }
0x167b   : > { %v1784_v48 = vmul.f32 %v2543_v20, %v1782_v47 }
0x167c   : > { %1786 = vrot.lane.b32.xlu0 %v1760_v46, %s2837_s17 }
0x167d   : > { %1790 = vrot.lane.b32.xlu1 %v1784_v48, %s2839_s15 }
0x1680   : > { %1797 = vrot.lane.b32.xlu0 %v1754_v27, %s2840_s29 }
0x1681   : > { %1803 = vrot.lane.b32.xlu1 %v1778_v31, %s2840_s29 }
0x16ee   : > { %v1787_v49 = vpop.permute.xlu0 %1786  ;;  %1810 = sbr.rel (%p2067_p1) target bundleno = 6088 (0x17c8), region = 88 }
0x16ef   : > { %v1791_v2 = vpop.permute.xlu1 %1790 }
0x16f0   : > { %v1793_v15 = vsel %vm463_vm2, %v1787_v49, %v1791_v2 }
0x16f1   : > { %1795 = vst.msk [vmem:[#allocation2] sm:$0x3] %vm1794_vm5, %v1793_v15  ;;  %2134 = vmatmul.mubr.msk.f32.vlgmr.msra.gmra.mrb[0].mxu0 (!%p2067_p1), %vm656_vm3, %v1793_v15 }
0x16f2   : > { %v1798_v50 = vpop.permute.xlu0 %1797 }
0x16f3   : > { %1801 = vst.msk [vmem:[#allocation3] sm:$0x3] %vm1800_vm6, %v1798_v50  ;;  %v1804_v51 = vpop.permute.xlu1 %1803 }
0x16f4   : > { %1806 = vst.msk [vmem:[#allocation4] sm:$0x3] %vm1800_vm6, %v1804_v51 }
0x17c4   : > { %v1895_v63 = vpop.f32.mrb[0].mxu0 }
0x17c5   : > { %v1896_v0 = vadd.f32 %v2068_v62, %v1895_v63  ;;  %v2135_v1 = vpop.f32.mrb[1].mxu0 }
0x17c7   : > { %1899 = vst [vmem:[#allocation16] sm:$0x3] %v1896_v0 }
0x17c8 PF: > { %p2345_p6 = scmp.eq.s32.totalorder %s2927_s16, 1  ;;  %s2844_s26 = smov [#allocation16]  }
0x17c9   : > { %s1907_s21 = sshll.u32 %s2844_s26, 4  ;;  %s1908_s21 = int_to_ptr.vmem [resolvable:$true] %s1907_s21 }
0x17ca   : > { %s2720_s19 = scalar_lea.vmem %s1908_s21, 32  ;;  %p2727_p7 = scmp.lt.s32.totalorder %s1908_s21, %s1908_s21 }
0x17cb   : > { %p2721_p11 = scmp.ne.s32.totalorder %s1908_s21, %s2720_s19  ;;  %p2728_p9 = scmp.lt.s32.totalorder %s2720_s19, %s2720_s19 }
0x17cd   : > { %p2722_p0 = pnand %p2721_p11, %p2345_p6  ;;  %p2729_p2 = por %p2728_p9, %p2727_p7 }
0x17cf   : > { %p2723_p12 = pneg %p2722_p0 }
0x17d1   : > { %p2730_p3 = pnand %p2729_p2, %p2723_p12 }
0x17d3   : > { %2733 = shalt.err (!%p2730_p3)
}
0x17d4   : > { %s3546_s17 = sld [smem:[#allocation27_spill]] }
0x17da   : > { %s2734_s4 = scalar_lea.hbm %s3546_s17, 32 }
0x17db   : > { %p2735_p5 = scmp.ne.s32.totalorder %s3546_s17, %s2734_s4  ;;  %p2740_p10 = scmp.lt.u32.totalorder %s2734_s4, %s3546_s17 }
0x17dd   : > { %p2736_p8 = pnand %p2735_p5, %p2345_p6 }
0x17df   : > { %p2737_p13 = pneg %p2736_p8 }
0x17e1   : > { %p2742_p4 = pnand %p2740_p10, %p2737_p13 }
0x17e3   : > { %2745 = shalt.err (!%p2742_p4)
}
0x17e4   : > { %2313 = dma.vmem_to_hbm [thread:$0]  (%p2345_p6), %s1908_s21, 32, %s3546_s17, [#allocation7]  }
0x17e5   : > { %2795 = dma.done.wait (%p2345_p6), [#allocation7], 32  }
0x17e6   : > { %2797 = vsyncadd (%p2345_p6), [#allocation7], 4294967264 }
0x17e7 PF: > { %p25_p1 = scmp.ge.s32.totalorder %s3102_s9, 4   ;;  %s3547_s30 = smov %s2804_s10 }
0x17e8   : > { %s3548_s10 = smov %s2808_s11  ;;  %s3549_s11 = smov %s3119_s25 }
0x17e9   : > { %s3550_s12 = smov %s2816_s13  ;;  %s3551_s13 = smov %s2820_s14 }
0x17ea   : > { %s3552_s14 = smov %s3112_s22  ;;  %s3553_s15 = smov %s3102_s9 }
0x17eb   :  { %27 = sbr.rel (!%p25_p1) target bundleno = 15 (0xf), region = 130 }
0x17f2   :  { %1920 = vsyncpa [#allocation6], 1 }
0x17f3   :  { %1922 = vsyncpa [#allocation6 + $0x1], 1 }
0x17f4   :  { %1923 = vsyncpa [#allocation9], 1 }
0x17f5   :  { %1925 = vsyncpa [#allocation9 + $0x1], 1 }
0x17f6   :  { %1926 = vsyncpa [#allocation12], 1 }
0x17f7   :  { %1927 = vsyncpa [#allocation15], 1 }
0x17f8   :  { %1928 = vsyncpa [#allocation7], 1 }
0x17f9   :  { %1930 = vsyncpa [#allocation7 + $0x1], 1 }

</bundles_post_ra>
